<compile_context>
chip_gen: v7x
topology: tpu7x:2x2x1
jax: 0.10.0
libtpu: 0.0.40
codegen_flags: <defaults>
</compile_context>

<pallas_src>
import numpy as np
import jax
import jax.numpy as jnp
from jax.experimental import pallas as pl
from jax.experimental.pallas import tpu as pltpu

_LN_EPS = 1e-5
_INV_SQRT2 = 0.7071067811865476
_GELU_C = 0.7978845608028654  # sqrt(2/pi)


# ----------------------------------------------------------------------------
# Offline folding of the fixed n_qubit VQC (AngleEmbedding RX +
# BasicEntanglerLayers + <Z_i>) into real quadratic-form matrices:
#   <Z_i>(x) = sum_{b,b'} p_b(x) * A[i, b, b'] * p_{b'}(x)
#   p_b(x)   = prod_j (cos(x_j/2) if bit_j(b)==0 else sin(x_j/2))
# ----------------------------------------------------------------------------
def _vqc_observable_tensor(weights: np.ndarray, n_qubits: int) -> np.ndarray:
    dim = 1 << n_qubits
    eye2 = np.eye(2, dtype=np.complex128)

    def rx(theta):
        c, s = np.cos(theta / 2.0), np.sin(theta / 2.0)
        return np.array([[c, -1j * s], [-1j * s, c]], dtype=np.complex128)

    def single(gate, wire):
        # qubit j <-> bit j of the basis index (qubit 0 = LSB)
        mats = [eye2] * n_qubits
        mats[wire] = gate
        full = np.array([[1.0 + 0j]], dtype=np.complex128)
        for j in reversed(range(n_qubits)):
            full = np.kron(full, mats[j])
        return full

    def cnot(control, target):
        m = np.zeros((dim, dim), dtype=np.complex128)
        for b in range(dim):
            b2 = b ^ (1 << target) if (b >> control) & 1 else b
            m[b2, b] = 1.0
        return m

    # BasicEntanglerLayers: per layer, RX on every wire then a CNOT ring.
    u = np.eye(dim, dtype=np.complex128)
    for l in range(weights.shape[0]):
        for wi in range(n_qubits):
            u = single(rx(weights[l, wi]), wi) @ u
        if n_qubits == 2:
            u = cnot(0, 1) @ u
        elif n_qubits > 2:
            for wi in range(n_qubits):
                u = cnot(wi, (wi + 1) % n_qubits) @ u

    popcount = np.array([bin(b).count("1") for b in range(dim)])
    d = np.diag((1j) ** popcount)  # phase of the RX-embedded product state
    mats = []
    for wi in range(n_qubits):
        z = np.diag((1.0 - 2.0 * ((np.arange(dim) >> wi) & 1)).astype(np.complex128))
        m = u.conj().T @ z @ u
        mats.append(np.real(d @ m @ d.conj().T))
    return np.stack(mats, axis=0).astype(np.float32)      # (nq, dim, dim)


def _layernorm(x, gamma, beta, eps=_LN_EPS):
    mu = jnp.mean(x, axis=-1, keepdims=True)
    xc = x - mu
    var = jnp.mean(xc * xc, axis=-1, keepdims=True)
    return xc * jax.lax.rsqrt(var + eps) * gamma + beta


def _pick_tile(n, candidates):
    for c in candidates:
        if n % c == 0:
            return c
    return n


# ----------------------------------------------------------------------------
# Kernel 1: ln1 + RWKV time mixing (sequential WKV recurrence) + residual.
# Grid = (B,): one batch element per grid step ("parallel").
# ----------------------------------------------------------------------------
def _time_mix_kernel(x_ref, g1_ref, b1_ref, wkvr_ref, wo_ref,
                     wdec_ref, u_ref, aa_ref, bb_ref, pp_ref,
                     y_ref, aa_o_ref, bb_o_ref, pp_o_ref,
                     kvr_scr, k_scr, v_scr, wkv_scr):
    seq_len, C = x_ref.shape
    SP = k_scr.shape[1]                # number of 128-lane channel chunks
    SPL = SP * 128

    x = x_ref[...]                                        # (T, C) f32
    xn = _layernorm(x, g1_ref[...], b1_ref[...])
    # one fused (T, C) @ (C, 3*SPL) MXU pass for k / v / receptance
    kvr_scr[...] = jnp.dot(xn.astype(wkvr_ref.dtype), wkvr_ref[...],
                           preferred_element_type=jnp.float32)

    # Repack k / v into the (T, SP, 128) recurrence layout (channel lane-chunks
    # stacked on sublanes) so the serial loop works on full vregs.  One-time
    # relayout, amortized over the T serial steps; pad lanes are already zero
    # because the fused weight was zero-padded offline.
    for j in range(SP):
        k_scr[:, j, :] = kvr_scr[:, j * 128:(j + 1) * 128]
        v_scr[:, j, :] = kvr_scr[:, SPL + j * 128:SPL + (j + 1) * 128]

    w = wdec_ref[...]                                     # exp(decay), (SP,128)
    u = u_ref[...]                                        # time_first, (SP,128)

    def step(t, carry):
        aa, bb, pp = carry                                # each (SP, 128) f32
        kt = k_scr[t]
        vt = v_scr[t]
        ww = u + kt
        q = jnp.maximum(pp, ww)
        e1 = jnp.exp(pp - q)
        e2 = jnp.exp(ww - q)
        wkv_scr[t] = (e1 * aa + e2 * vt) * pl.reciprocal(e1 * bb + e2,
                                                         approx=True)
        ww = pp - w
        q = jnp.maximum(ww, kt)
        e1 = jnp.exp(ww - q)
        e2 = jnp.exp(kt - q)
        return (e1 * aa + e2 * vt, e1 * bb + e2, q)

    aa_f, bb_f, pp_f = jax.lax.fori_loop(
        0, seq_len, step, (aa_ref[...], bb_ref[...], pp_ref[...]), unroll=8)

    # receptance gate (after the loop) + unpack wkv back to (T, C)
    r = jax.nn.sigmoid(kvr_scr[:, 2 * SPL:2 * SPL + C])
    cols = [wkv_scr[:, j, :] for j in range(SP)]
    wkv = cols[0] if SP == 1 else jnp.concatenate(cols, axis=-1)
    rwkv = (r * wkv[:, :C]).astype(wo_ref.dtype)
    att = jnp.dot(rwkv, wo_ref[...], preferred_element_type=jnp.float32)
    y_ref[...] = (x + att).astype(y_ref.dtype)            # residual (bf16 out)
    aa_o_ref[...] = aa_f
    bb_o_ref[...] = bb_f
    pp_o_ref[...] = pp_f


# ----------------------------------------------------------------------------
# Kernel 2: ln2 + quantum channel mixing + residual.
# Grid = (B, T // tile_t, n_inter // inter_blk).  For the default config the
# last axis has a single step (FFN weights fully VMEM-resident).
# ----------------------------------------------------------------------------
def _channel_mix_kernel(y_ref, prev_ref, g2_ref, b2_ref, tmk_ref, tmr_ref,
                        wr_ref, w1_ref, w2f_ref, wqin_ref, mask_ref, wq2_ref,
                        out_ref, acc_scr, xk_scr, r_scr):
    kb = pl.program_id(2)
    nk = pl.num_programs(2)

    @pl.when(kb == 0)
    def _init():
        y = y_ref[...].astype(jnp.float32)                # (tile, C)
        xn = _layernorm(y, g2_ref[...], b2_ref[...])
        prev = prev_ref[...]                              # (1, C) broadcast row
        xk = prev + tmk_ref[...] * (xn - prev)
        xr = prev + tmr_ref[...] * (xn - prev)
        xk_scr[...] = xk.astype(xk_scr.dtype)             # bf16 (MXU LHS only)
        # receptance gate
        r_scr[...] = jax.nn.sigmoid(
            jnp.dot(xr.astype(wr_ref.dtype), wr_ref[...],
                    preferred_element_type=jnp.float32))
        # quantum branch: analytic VQC folded into (tile, 4^nq) @ (4^nq, C)
        q_in = jnp.dot(xk.astype(wqin_ref.dtype), wqin_ref[...],
                       preferred_element_type=jnp.float32)    # (tile, nq)
        ch = jnp.cos(0.5 * q_in)
        sh = jnp.sin(0.5 * q_in)
        nq = wqin_ref.shape[1]
        amp2 = None                                       # (tile, 4^nq)
        for j in range(nq):                               # static unroll (nq=4)
            cj = ch[:, j:j + 1]
            sj = sh[:, j:j + 1]
            lo = mask_ref[j:j + 1, :]                     # bit j   (ket index)
            hi = mask_ref[nq + j:nq + j + 1, :]           # bit nq+j (bra index)
            f = (cj + (sj - cj) * lo) * (cj + (sj - cj) * hi)
            amp2 = f if amp2 is None else amp2 * f
        acc_scr[...] = jnp.dot(amp2.astype(wq2_ref.dtype), wq2_ref[...],
                               preferred_element_type=jnp.float32)

    # classical FFN partial sum: gelu(xk @ W1[:, kblk]) @ (W2 @ Wfuse)[kblk, :]
    h = jnp.dot(xk_scr[...], w1_ref[...], preferred_element_type=jnp.float32)
    g = 0.5 * h * (1.0 + jnp.tanh(_GELU_C * (h + 0.044715 * h * h * h)))
    acc_scr[...] += jnp.dot(g.astype(w2f_ref.dtype), w2f_ref[...],
                            preferred_element_type=jnp.float32)

    @pl.when(kb == nk - 1)
    def _finalize():
        out_ref[...] = (y_ref[...].astype(jnp.float32)
                        + r_scr[...] * acc_scr[...]).astype(out_ref.dtype)


# ----------------------------------------------------------------------------
# Parameter init (shapes match the PyTorch module) + offline folding / casts.
# ----------------------------------------------------------------------------
def init_params(key, n_embd, n_head, n_intermediate, n_qubits, q_depth):
    C = n_embd
    ks = jax.random.split(key, 11)

    def lin(k, fi, fo):
        b = 1.0 / np.sqrt(fi)
        return jax.random.uniform(k, (fi, fo), jnp.float32, -b, b)

    ratio_c = jnp.arange(C, dtype=jnp.float32) / (C - 1 if C > 1 else 1)
    vqc_w = np.asarray(
        jax.random.uniform(ks[10], (q_depth, n_qubits), jnp.float32, 0.0, 2.0 * np.pi),
        dtype=np.float64)
    a_all = _vqc_observable_tensor(vqc_w, n_qubits)       # (nq, 2^nq, 2^nq)

    # NOTE: RWKVTimeMixing's time_mix_k/v/r parameters are unused in its
    # forward() (it projects raw x), so they are omitted here.
    return dict(
        ln1_g=jnp.ones((C,), jnp.float32), ln1_b=jnp.zeros((C,), jnp.float32),
        ln2_g=jnp.ones((C,), jnp.float32), ln2_b=jnp.zeros((C,), jnp.float32),
        time_decay=(-5.0 + 8.0 * (jnp.arange(C, dtype=jnp.float32)
                                  / (C - 1 if C > 1 else 1.0)) ** 0.7),
        time_first=jnp.full((C,), -3.0, jnp.float32),
        w_k=lin(ks[0], C, C), w_v=lin(ks[1], C, C),
        w_r_att=lin(ks[2], C, C), w_o=lin(ks[3], C, C),
        time_mix_k=ratio_c, time_mix_r=ratio_c,
        w_r_cm=lin(ks[4], C, C),
        w_fc1=lin(ks[5], C, n_intermediate), w_fc2=lin(ks[6], n_intermediate, C),
        w_qin=lin(ks[7], C, n_qubits), w_qout=lin(ks[8], n_qubits, C),
        w_fuse=lin(ks[9], C, C),
        a_all=jnp.asarray(a_all),
    )


def prepare_kernel_params(p, w_dtype=jnp.bfloat16):
    """Offline folding (exp(decay), fused k/v/r, W_fuse into fc2 & VQC readout)
    plus bf16 casts and lane-padding for the packed recurrence layout."""
    C = p["w_k"].shape[0]
    nq = p["w_qin"].shape[1]
    dim = 1 << nq
    SP = -(-C // 128)
    SPL = SP * 128

    def pad_cols(w):                       # (C, C) -> (C, SPL), zero columns
        return jnp.pad(w, ((0, 0), (0, SPL - C)))

    def pad_row(v):                        # (C,) -> (SP, 128), zero pad lanes
        return jnp.pad(v, (0, SPL - C)).reshape(SP, 128)

    # fused & padded k / v / receptance projection: (C, 3*SPL)
    w_kvr = jnp.concatenate(
        [pad_cols(p["w_k"]), pad_cols(p["w_v"]), pad_cols(p["w_r_att"])],
        axis=1).astype(w_dtype)

    w2f = p["w_fc2"] @ p["w_fuse"]                        # (n_inter, C)
    wqf = p["w_qout"] @ p["w_fuse"]                       # (nq, C)
    # W_q2[b*dim + b', c] = sum_i A[i, b, b'] * (W_qout @ W_fuse)[i, c]
    wq2 = jnp.einsum("ibc,id->bcd", p["a_all"], wqf).reshape(dim * dim, C)
    cols = np.arange(dim * dim, dtype=np.int64)
    mask = ((cols[None, :] >> np.arange(2 * nq, dtype=np.int64)[:, None]) & 1
            ).astype(np.float32)                          # (2*nq, dim*dim)

    return dict(
        ln1_g=p["ln1_g"].reshape(1, C), ln1_b=p["ln1_b"].reshape(1, C),
        ln2_g=p["ln2_g"].reshape(1, C), ln2_b=p["ln2_b"].reshape(1, C),
        w_exp_decay=pad_row(jnp.exp(p["time_decay"])),    # exp folded offline
        time_first_p=pad_row(p["time_first"]),
        time_mix_k=p["time_mix_k"].reshape(1, C),
        time_mix_r=p["time_mix_r"].reshape(1, C),
        w_kvr=w_kvr,
        w_o=p["w_o"].astype(w_dtype),
        w_r_cm=p["w_r_cm"].astype(w_dtype),
        w_fc1=p["w_fc1"].astype(w_dtype),
        w_fc2_fused=w2f.astype(w_dtype),
        w_qin=p["w_qin"].astype(w_dtype),
        w_q2=wq2.astype(w_dtype),
        mask=jnp.asarray(mask),
    )


# ----------------------------------------------------------------------------
# Wrapper: full QuantumRWKVBlock forward.
# ----------------------------------------------------------------------------
def quantum_rwkv_block(x, time_mix_state, channel_mix_state, kp,
                       *, tile_t=None, inter_blk=None):
    B, T, C = x.shape
    x = x.astype(jnp.float32)
    SP = kp["w_exp_decay"].shape[0]
    SPL = SP * 128

    def pad_state(s):                      # (B, C) -> (B, SP, 128)
        return jnp.pad(s.astype(jnp.float32),
                       ((0, 0), (0, SPL - C))).reshape(B, SP, 128)

    aa, bb, pp = time_mix_state
    aa_p, bb_p, pp_p = pad_state(aa), pad_state(bb), pad_state(pp)
    prev3 = channel_mix_state.reshape(B, 1, C).astype(jnp.float32)

    # ---- kernel 1: time mixing ----
    seq_spec = pl.BlockSpec((None, T, C), lambda b: (b, 0, 0))
    row_spec = pl.BlockSpec((1, C), lambda b: (0, 0))
    packed_row_spec = pl.BlockSpec((SP, 128), lambda b: (0, 0))
    st_spec = pl.BlockSpec((None, SP, 128), lambda b: (b, 0, 0))

    cparams1 = pltpu.CompilerParams(dimension_semantics=("parallel",),
                                    vmem_limit_bytes=64 * 1024 * 1024)

    y, naa, nbb, npp = pl.pallas_call(
        _time_mix_kernel,
        out_shape=(jax.ShapeDtypeStruct((B, T, C), jnp.bfloat16),
                   jax.ShapeDtypeStruct((B, SP, 128), jnp.float32),
                   jax.ShapeDtypeStruct((B, SP, 128), jnp.float32),
                   jax.ShapeDtypeStruct((B, SP, 128), jnp.float32)),
        grid_spec=pltpu.PrefetchScalarGridSpec(
            num_scalar_prefetch=0,
            grid=(B,),
            in_specs=[seq_spec,                                 # x
                      row_spec, row_spec,                       # ln1 gamma/beta
                      pl.BlockSpec((C, 3 * SPL), lambda b: (0, 0)),  # fused Wkvr
                      pl.BlockSpec((C, C), lambda b: (0, 0)),        # W_o
                      packed_row_spec, packed_row_spec,         # exp(decay), u
                      st_spec, st_spec, st_spec],               # aa / bb / pp
            out_specs=(seq_spec, st_spec, st_spec, st_spec),
            scratch_shapes=[pltpu.VMEM((T, 3 * SPL), jnp.float32),   # k|v|r proj
                            pltpu.VMEM((T, SP, 128), jnp.float32),   # k packed
                            pltpu.VMEM((T, SP, 128), jnp.float32),   # v packed
                            pltpu.VMEM((T, SP, 128), jnp.float32)]), # wkv packed
        compiler_params=cparams1,
    )(x, kp["ln1_g"], kp["ln1_b"], kp["w_kvr"], kp["w_o"],
      kp["w_exp_decay"], kp["time_first_p"], aa_p, bb_p, pp_p)

    # ---- kernel 2: channel mixing ----
    n_inter = kp["w_fc1"].shape[1]
    nq = kp["w_qin"].shape[1]
    dsq = kp["w_q2"].shape[0]
    if tile_t is None:
        tile_t = _pick_tile(T, (256, 128, 64, 32, 16, 8))
    if inter_blk is None:
        itemsize = kp["w_fc1"].dtype.itemsize
        fc_bytes = (kp["w_fc1"].size + kp["w_fc2_fused"].size) * itemsize
        if fc_bytes <= 24 * 1024 * 1024:
            inter_blk = n_inter            # weights fully VMEM-resident
        else:
            inter_blk = _pick_tile(n_inter, (512, 256, 128))
    grid2 = (B, T // tile_t, n_inter // inter_blk)

    cparams2 = pltpu.CompilerParams(
        dimension_semantics=("parallel", "parallel", "arbitrary"),
        vmem_limit_bytes=48 * 1024 * 1024)

    out = pl.pallas_call(
        _channel_mix_kernel,
        out_shape=jax.ShapeDtypeStruct((B, T, C), x.dtype),
        grid_spec=pltpu.PrefetchScalarGridSpec(
            num_scalar_prefetch=0,
            grid=grid2,
            in_specs=[
                pl.BlockSpec((None, tile_t, C), lambda b, t, k: (b, t, 0)),  # y
                pl.BlockSpec((None, 1, C), lambda b, t, k: (b, 0, 0)),       # prev
                pl.BlockSpec((1, C), lambda b, t, k: (0, 0)),                # ln2 g
                pl.BlockSpec((1, C), lambda b, t, k: (0, 0)),                # ln2 b
                pl.BlockSpec((1, C), lambda b, t, k: (0, 0)),                # tmk
                pl.BlockSpec((1, C), lambda b, t, k: (0, 0)),                # tmr
                pl.BlockSpec((C, C), lambda b, t, k: (0, 0)),                # W_r
                pl.BlockSpec((C, inter_blk), lambda b, t, k: (0, k)),        # W_fc1
                pl.BlockSpec((inter_blk, C), lambda b, t, k: (k, 0)),        # W_fc2@Wfuse
                pl.BlockSpec((C, nq), lambda b, t, k: (0, 0)),               # W_qin
                pl.BlockSpec((2 * nq, dsq), lambda b, t, k: (0, 0)),         # bit mask
                pl.BlockSpec((dsq, C), lambda b, t, k: (0, 0)),              # VQC readout
            ],
            out_specs=pl.BlockSpec((None, tile_t, C), lambda b, t, k: (b, t, 0)),
            scratch_shapes=[pltpu.VMEM((tile_t, C), jnp.float32),    # acc
                            pltpu.VMEM((tile_t, C), jnp.bfloat16),   # xk (MXU LHS)
                            pltpu.VMEM((tile_t, C), jnp.float32)]),  # r gate
        compiler_params=cparams2,
    )(y, prev3, kp["ln2_g"], kp["ln2_b"], kp["time_mix_k"], kp["time_mix_r"],
      kp["w_r_cm"], kp["w_fc1"], kp["w_fc2_fused"], kp["w_qin"], kp["mask"],
      kp["w_q2"])

    # new channel-mix state = ln2(y)[:, -1, :]  (tiny (B, C) op, done in JAX)
    new_cm = _layernorm(y[:, -1, :].astype(jnp.float32), kp["ln2_g"], kp["ln2_b"])
    unpad = lambda s: s.reshape(B, SPL)[:, :C]
    new_tm = (unpad(naa), unpad(nbb), unpad(npp))
    return out, new_tm, new_cm


# ----------------------------------------------------------------------------
# Pure-JAX f32 reference (mirrors the PyTorch module, no folding) for checking.
# ----------------------------------------------------------------------------
def _reference_block(x, time_mix_state, channel_mix_state, p):
    B, T, C = x.shape
    xn1 = _layernorm(x, p["ln1_g"], p["ln1_b"])
    k = xn1 @ p["w_k"]
    v = xn1 @ p["w_v"]
    r = jax.nn.sigmoid(xn1 @ p["w_r_att"])
    w = jnp.exp(p["time_decay"])
    u = p["time_first"]
    aa, bb, pp = time_mix_state
    wkv = []
    for t in range(T):
        kt = k[:, t, :]
        vt = v[:, t, :]
        ww = u + kt
        q = jnp.maximum(pp, ww)
        e1 = jnp.exp(pp - q)
        e2 = jnp.exp(ww - q)
        wkv.append((e1 * aa + e2 * vt) / (e1 * bb + e2))
        ww = pp - w
        q = jnp.maximum(ww, kt)
        e1 = jnp.exp(ww - q)
        e2 = jnp.exp(kt - q)
        aa = e1 * aa + e2 * vt
        bb = e1 * bb + e2
        pp = q
    wkv = jnp.stack(wkv, axis=1)
    y = x + (r * wkv) @ p["w_o"]

    xn2 = _layernorm(y, p["ln2_g"], p["ln2_b"])
    prev = channel_mix_state[:, None, :]
    xk = xn2 * p["time_mix_k"] + prev * (1.0 - p["time_mix_k"])
    xr = xn2 * p["time_mix_r"] + prev * (1.0 - p["time_mix_r"])
    rr = jax.nn.sigmoid(xr @ p["w_r_cm"])
    h = xk @ p["w_fc1"]
    g = 0.5 * h * (1.0 + jax.lax.erf(h * _INV_SQRT2))
    ffn_c = g @ p["w_fc2"]
    q_in = xk @ p["w_qin"]
    nq = q_in.shape[-1]
    dim = 1 << nq
    c = jnp.cos(0.5 * q_in)
    s = jnp.sin(0.5 * q_in)
    bits = ((jnp.arange(dim)[None, :] >> jnp.arange(nq)[:, None]) & 1).astype(x.dtype)
    pamp = jnp.ones(q_in.shape[:-1] + (dim,), x.dtype)
    for j in range(nq):
        pamp = pamp * (c[..., j:j + 1] * (1.0 - bits[j]) + s[..., j:j + 1] * bits[j])
    vqc = jnp.einsum("xty,iyz,xtz->xti", pamp, p["a_all"], pamp)
    q_out = vqc @ p["w_qout"]
    fused = (ffn_c + q_out) @ p["w_fuse"]
    out = y + rr * fused
    return out, (aa, bb, pp), xn2[:, -1, :]


if __name__ == "__main__":
    cfg = dict(n_embd=32, n_head=4, n_intermediate=128, n_qubits=4, q_depth=2)
    B, T, C = 2, 8, cfg["n_embd"]

    key = jax.random.PRNGKey(0)
    kx, kcm, kpar = jax.random.split(key, 3)
    params = init_params(kpar, **cfg)
    kparams = prepare_kernel_params(params)

    x = jax.random.normal(kx, (B, T, C), jnp.float32)
    # PyTorch-default initial recurrent states
    time_mix_state = (jnp.zeros((B, C), jnp.float32),
                      jnp.zeros((B, C), jnp.float32),
                      jnp.full((B, C), -1e38, jnp.float32))
    channel_mix_state = jax.random.normal(kcm, (B, C), jnp.float32)

    out, new_tm, new_cm = quantum_rwkv_block(x, time_mix_state, channel_mix_state,
                                             kparams)
    out = jax.block_until_ready(out)
    new_cm = jax.block_until_ready(new_cm)

    ref_out, ref_tm, ref_cm = _reference_block(x, time_mix_state,
                                               channel_mix_state, params)
    assert out.shape == (B, T, C) and new_cm.shape == (B, C)
    np.testing.assert_allclose(np.asarray(out), np.asarray(ref_out),
                               rtol=3e-2, atol=3e-2)
    for got, want in zip(new_tm, ref_tm):
        np.testing.assert_allclose(np.asarray(got), np.asarray(want),
                                   rtol=3e-2, atol=3e-2)
    np.testing.assert_allclose(np.asarray(new_cm), np.asarray(ref_cm),
                               rtol=3e-2, atol=3e-2)

    print("KERNEL_OK")
</pallas_src>

<mosaic_0001>
module attributes {stable_mosaic.version = 11 : i64} {
  func.func @_time_mix_kernel(%arg0: i32, %arg1: memref<1x8x32xf32, #tpu.memory_space<vmem>>, %arg2: memref<1x32xf32, #tpu.memory_space<vmem>>, %arg3: memref<1x32xf32, #tpu.memory_space<vmem>>, %arg4: memref<32x384xbf16, #tpu.memory_space<vmem>>, %arg5: memref<32x32xbf16, #tpu.memory_space<vmem>>, %arg6: memref<1x128xf32, #tpu.memory_space<vmem>>, %arg7: memref<1x128xf32, #tpu.memory_space<vmem>>, %arg8: memref<1x1x128xf32, #tpu.memory_space<vmem>>, %arg9: memref<1x1x128xf32, #tpu.memory_space<vmem>>, %arg10: memref<1x1x128xf32, #tpu.memory_space<vmem>>, %arg11: memref<1x8x32xbf16, #tpu.memory_space<vmem>>, %arg12: memref<1x1x128xf32, #tpu.memory_space<vmem>>, %arg13: memref<1x1x128xf32, #tpu.memory_space<vmem>>, %arg14: memref<1x1x128xf32, #tpu.memory_space<vmem>>, %arg15: memref<8x384xf32, #tpu.memory_space<vmem>>, %arg16: memref<8x1x128xf32, #tpu.memory_space<vmem>>, %arg17: memref<8x1x128xf32, #tpu.memory_space<vmem>>, %arg18: memref<8x1x128xf32, #tpu.memory_space<vmem>>) attributes {dimension_semantics = [#tpu.dimension_semantics<parallel>], iteration_bounds = array<i64: 2>, scalar_prefetch = 0 : i64, scratch_operands = 4 : i64, tpu.core_type = #tpu.core_type<tc>, window_params = [{transform_indices = @transform_0, window_bounds = array<i64: 1, 8, 32>}, {pipeline_mode = #tpu.pipeline_mode<synchronous>, transform_indices = @transform_1, window_bounds = array<i64: 1, 32>}, {pipeline_mode = #tpu.pipeline_mode<synchronous>, transform_indices = @transform_2, window_bounds = array<i64: 1, 32>}, {pipeline_mode = #tpu.pipeline_mode<synchronous>, transform_indices = @transform_3, window_bounds = array<i64: 32, 384>}, {pipeline_mode = #tpu.pipeline_mode<synchronous>, transform_indices = @transform_4, window_bounds = array<i64: 32, 32>}, {pipeline_mode = #tpu.pipeline_mode<synchronous>, transform_indices = @transform_5, window_bounds = array<i64: 1, 128>}, {pipeline_mode = #tpu.pipeline_mode<synchronous>, transform_indices = @transform_6, window_bounds = array<i64: 1, 128>}, {transform_indices = @transform_7, window_bounds = array<i64: 1, 1, 128>}, {transform_indices = @transform_8, window_bounds = array<i64: 1, 1, 128>}, {transform_indices = @transform_9, window_bounds = array<i64: 1, 1, 128>}, {transform_indices = @transform_10, window_bounds = array<i64: 1, 8, 32>}, {transform_indices = @transform_11, window_bounds = array<i64: 1, 1, 128>}, {transform_indices = @transform_12, window_bounds = array<i64: 1, 1, 128>}, {transform_indices = @transform_13, window_bounds = array<i64: 1, 1, 128>}]} {
    %c0 = arith.constant 0 : index
    %c0_0 = arith.constant 0 : index
    %c0_1 = arith.constant 0 : index
    %0 = vector.load %arg1[%c0, %c0_0, %c0_1] : memref<1x8x32xf32, #tpu.memory_space<vmem>>, vector<1x8x32xf32>
    %1 = vector.shape_cast %0 : vector<1x8x32xf32> to vector<8x32xf32>
    %c0_2 = arith.constant 0 : index
    %c0_3 = arith.constant 0 : index
    %2 = vector.load %arg2[%c0_2, %c0_3] : memref<1x32xf32, #tpu.memory_space<vmem>>, vector<1x32xf32>
    %c0_4 = arith.constant 0 : index
    %c0_5 = arith.constant 0 : index
    %3 = vector.load %arg3[%c0_4, %c0_5] : memref<1x32xf32, #tpu.memory_space<vmem>>, vector<1x32xf32>
    %cst = arith.constant dense<0.000000e+00> : vector<8xf32>
    %4 = vector.multi_reduction <add>, %1, %cst [1] : vector<8x32xf32> to vector<8xf32>
    %5 = vector.shape_cast %4 : vector<8xf32> to vector<8x1xf32>
    %cst_6 = arith.constant 3.200000e+01 : f32
    %6 = vector.broadcast %cst_6 : f32 to vector<8x1xf32>
    %7 = arith.divf %5, %6 : vector<8x1xf32>
    %8 = vector.broadcast %7 : vector<8x1xf32> to vector<8x32xf32>
    %9 = arith.subf %1, %8 : vector<8x32xf32>
    %10 = arith.mulf %9, %9 : vector<8x32xf32>
    %cst_7 = arith.constant dense<0.000000e+00> : vector<8xf32>
    %11 = vector.multi_reduction <add>, %10, %cst_7 [1] : vector<8x32xf32> to vector<8xf32>
    %12 = vector.shape_cast %11 : vector<8xf32> to vector<8x1xf32>
    %cst_8 = arith.constant 3.200000e+01 : f32
    %13 = vector.broadcast %cst_8 : f32 to vector<8x1xf32>
    %14 = arith.divf %12, %13 : vector<8x1xf32>
    %cst_9 = arith.constant 9.99999974E-6 : f32
    %15 = vector.broadcast %cst_9 : f32 to vector<8x1xf32>
    %16 = arith.addf %14, %15 : vector<8x1xf32>
    %17 = math.rsqrt %16 : vector<8x1xf32>
    %18 = vector.broadcast %17 : vector<8x1xf32> to vector<8x32xf32>
    %19 = arith.mulf %9, %18 : vector<8x32xf32>
    %20 = vector.broadcast %2 : vector<1x32xf32> to vector<8x32xf32>
    %21 = arith.mulf %19, %20 : vector<8x32xf32>
    %22 = vector.broadcast %3 : vector<1x32xf32> to vector<8x32xf32>
    %23 = arith.addf %21, %22 : vector<8x32xf32>
    %24 = arith.truncf %23 : vector<8x32xf32> to vector<8x32xbf16>
    %c0_10 = arith.constant 0 : index
    %c0_11 = arith.constant 0 : index
    %25 = vector.load %arg4[%c0_10, %c0_11] : memref<32x384xbf16, #tpu.memory_space<vmem>>, vector<32x384xbf16>
    %cst_12 = arith.constant dense<0.000000e+00> : vector<8x384xf32>
    %26 = tpu.matmul %24, %25, %cst_12 {dimension_numbers = #tpu.dot_dimension_numbers<[1], [0], [0], [1], [0, 0, 1, 1], [], []>} : vector<8x32xbf16>, vector<32x384xbf16>, vector<8x384xf32> -> vector<8x384xf32>
    %c0_13 = arith.constant 0 : index
    %c0_14 = arith.constant 0 : index
    %27 = vector.load %arg15[%c0_13, %c0_14] : memref<8x384xf32, #tpu.memory_space<vmem>>, vector<8x384xf32>
    tpu.vector_store %arg15[%c0_13, %c0_14], %26 {strides = array<i32>} : memref<8x384xf32, #tpu.memory_space<vmem>>, vector<8x384xf32>,
    %c0_15 = arith.constant 0 : index
    %c0_16 = arith.constant 0 : index
    %28 = vector.load %arg15[%c0_15, %c0_16] : memref<8x384xf32, #tpu.memory_space<vmem>>, vector<8x128xf32>
    %c0_17 = arith.constant 0 : index
    %c0_18 = arith.constant 0 : index
    %c0_19 = arith.constant 0 : index
    %29 = vector.load %arg16[%c0_17, %c0_18, %c0_19] : memref<8x1x128xf32, #tpu.memory_space<vmem>>, vector<8x1x128xf32>
    %30 = vector.shape_cast %29 : vector<8x1x128xf32> to vector<8x128xf32>
    %31 = vector.shape_cast %28 : vector<8x128xf32> to vector<8x1x128xf32>
    tpu.vector_store %arg16[%c0_17, %c0_18, %c0_19], %31 {strides = array<i32>} : memref<8x1x128xf32, #tpu.memory_space<vmem>>, vector<8x1x128xf32>,
    %c0_20 = arith.constant 0 : index
    %c128 = arith.constant 128 : index
    %32 = vector.load %arg15[%c0_20, %c128] : memref<8x384xf32, #tpu.memory_space<vmem>>, vector<8x128xf32>
    %c0_21 = arith.constant 0 : index
    %c0_22 = arith.constant 0 : index
    %c0_23 = arith.constant 0 : index
    %33 = vector.load %arg17[%c0_21, %c0_22, %c0_23] : memref<8x1x128xf32, #tpu.memory_space<vmem>>, vector<8x1x128xf32>
    %34 = vector.shape_cast %33 : vector<8x1x128xf32> to vector<8x128xf32>
    %35 = vector.shape_cast %32 : vector<8x128xf32> to vector<8x1x128xf32>
    tpu.vector_store %arg17[%c0_21, %c0_22, %c0_23], %35 {strides = array<i32>} : memref<8x1x128xf32, #tpu.memory_space<vmem>>, vector<8x1x128xf32>,
    %c0_24 = arith.constant 0 : index
    %c0_25 = arith.constant 0 : index
    %36 = vector.load %arg6[%c0_24, %c0_25] : memref<1x128xf32, #tpu.memory_space<vmem>>, vector<1x128xf32>
    %c0_26 = arith.constant 0 : index
    %c0_27 = arith.constant 0 : index
    %37 = vector.load %arg7[%c0_26, %c0_27] : memref<1x128xf32, #tpu.memory_space<vmem>>, vector<1x128xf32>
    %c0_28 = arith.constant 0 : index
    %c0_29 = arith.constant 0 : index
    %c0_30 = arith.constant 0 : index
    %38 = vector.load %arg8[%c0_28, %c0_29, %c0_30] : memref<1x1x128xf32, #tpu.memory_space<vmem>>, vector<1x1x128xf32>
    %39 = vector.shape_cast %38 : vector<1x1x128xf32> to vector<1x128xf32>
    %c0_31 = arith.constant 0 : index
    %c0_32 = arith.constant 0 : index
    %c0_33 = arith.constant 0 : index
    %40 = vector.load %arg9[%c0_31, %c0_32, %c0_33] : memref<1x1x128xf32, #tpu.memory_space<vmem>>, vector<1x1x128xf32>
    %41 = vector.shape_cast %40 : vector<1x1x128xf32> to vector<1x128xf32>
    %c0_34 = arith.constant 0 : index
    %c0_35 = arith.constant 0 : index
    %c0_36 = arith.constant 0 : index
    %42 = vector.load %arg10[%c0_34, %c0_35, %c0_36] : memref<1x1x128xf32, #tpu.memory_space<vmem>>, vector<1x1x128xf32>
    %43 = vector.shape_cast %42 : vector<1x1x128xf32> to vector<1x128xf32>
    %c0_i32 = arith.constant 0 : i32
    %44 = arith.index_cast %c0_i32 : i32 to index
    %c0_37 = arith.constant 0 : index
    %c0_38 = arith.constant 0 : index
    %45 = vector.load %arg16[%44, %c0_37, %c0_38] : memref<8x1x128xf32, #tpu.memory_space<vmem>>, vector<1x1x128xf32>
    %46 = vector.shape_cast %45 : vector<1x1x128xf32> to vector<1x128xf32>
    %47 = arith.index_cast %c0_i32 : i32 to index
    %c0_39 = arith.constant 0 : index
    %c0_40 = arith.constant 0 : index
    %48 = vector.load %arg17[%47, %c0_39, %c0_40] : memref<8x1x128xf32, #tpu.memory_space<vmem>>, vector<1x1x128xf32>
    %49 = vector.shape_cast %48 : vector<1x1x128xf32> to vector<1x128xf32>
    %50 = arith.addf %37, %46 : vector<1x128xf32>
    %51 = arith.maximumf %43, %50 : vector<1x128xf32>
    %52 = arith.subf %43, %51 : vector<1x128xf32>
    %53 = math.exp %52 : vector<1x128xf32>
    %54 = arith.subf %50, %51 : vector<1x128xf32>
    %55 = math.exp %54 : vector<1x128xf32>
    %56 = arith.mulf %53, %39 : vector<1x128xf32>
    %57 = arith.mulf %55, %49 : vector<1x128xf32>
    %58 = arith.addf %56, %57 : vector<1x128xf32>
    %59 = arith.mulf %53, %41 : vector<1x128xf32>
    %60 = arith.addf %59, %55 : vector<1x128xf32>
    %61 = tpu.reciprocal %60 {approx = true} : vector<1x128xf32> -> vector<1x128xf32>
    %62 = arith.mulf %58, %61 : vector<1x128xf32>
    %63 = arith.index_cast %c0_i32 : i32 to index
    %c0_41 = arith.constant 0 : index
    %c0_42 = arith.constant 0 : index
    %64 = vector.load %arg18[%63, %c0_41, %c0_42] : memref<8x1x128xf32, #tpu.memory_space<vmem>>, vector<1x1x128xf32>
    %65 = vector.shape_cast %64 : vector<1x1x128xf32> to vector<1x128xf32>
    %66 = vector.shape_cast %62 : vector<1x128xf32> to vector<1x1x128xf32>
    tpu.vector_store %arg18[%63, %c0_41, %c0_42], %66 {strides = array<i32>} : memref<8x1x128xf32, #tpu.memory_space<vmem>>, vector<1x1x128xf32>,
    %67 = arith.subf %43, %36 : vector<1x128xf32>
    %68 = arith.maximumf %67, %46 : vector<1x128xf32>
    %69 = arith.subf %67, %68 : vector<1x128xf32>
    %70 = math.exp %69 : vector<1x128xf32>
    %71 = arith.subf %46, %68 : vector<1x128xf32>
    %72 = math.exp %71 : vector<1x128xf32>
    %73 = arith.mulf %70, %39 : vector<1x128xf32>
    %74 = arith.mulf %72, %49 : vector<1x128xf32>
    %75 = arith.addf %73, %74 : vector<1x128xf32>
    %76 = arith.mulf %70, %41 : vector<1x128xf32>
    %77 = arith.addf %76, %72 : vector<1x128xf32>
    %c1_i32 = arith.constant 1 : i32
    %78 = arith.index_cast %c1_i32 : i32 to index
    %c0_43 = arith.constant 0 : index
    %c0_44 = arith.constant 0 : index
    %79 = vector.load %arg16[%78, %c0_43, %c0_44] : memref<8x1x128xf32, #tpu.memory_space<vmem>>, vector<1x1x128xf32>
    %80 = vector.shape_cast %79 : vector<1x1x128xf32> to vector<1x128xf32>
    %81 = arith.index_cast %c1_i32 : i32 to index
    %c0_45 = arith.constant 0 : index
    %c0_46 = arith.constant 0 : index
    %82 = vector.load %arg17[%81, %c0_45, %c0_46] : memref<8x1x128xf32, #tpu.memory_space<vmem>>, vector<1x1x128xf32>
    %83 = vector.shape_cast %82 : vector<1x1x128xf32> to vector<1x128xf32>
    %84 = arith.addf %37, %80 : vector<1x128xf32>
    %85 = arith.maximumf %68, %84 : vector<1x128xf32>
    %86 = arith.subf %68, %85 : vector<1x128xf32>
    %87 = math.exp %86 : vector<1x128xf32>
    %88 = arith.subf %84, %85 : vector<1x128xf32>
    %89 = math.exp %88 : vector<1x128xf32>
    %90 = arith.mulf %87, %75 : vector<1x128xf32>
    %91 = arith.mulf %89, %83 : vector<1x128xf32>
    %92 = arith.addf %90, %91 : vector<1x128xf32>
    %93 = arith.mulf %87, %77 : vector<1x128xf32>
    %94 = arith.addf %93, %89 : vector<1x128xf32>
    %95 = tpu.reciprocal %94 {approx = true} : vector<1x128xf32> -> vector<1x128xf32>
    %96 = arith.mulf %92, %95 : vector<1x128xf32>
    %97 = arith.index_cast %c1_i32 : i32 to index
    %c0_47 = arith.constant 0 : index
    %c0_48 = arith.constant 0 : index
    %98 = vector.load %arg18[%97, %c0_47, %c0_48] : memref<8x1x128xf32, #tpu.memory_space<vmem>>, vector<1x1x128xf32>
    %99 = vector.shape_cast %98 : vector<1x1x128xf32> to vector<1x128xf32>
    %100 = vector.shape_cast %96 : vector<1x128xf32> to vector<1x1x128xf32>
    tpu.vector_store %arg18[%97, %c0_47, %c0_48], %100 {strides = array<i32>} : memref<8x1x128xf32, #tpu.memory_space<vmem>>, vector<1x1x128xf32>,
    %101 = arith.subf %68, %36 : vector<1x128xf32>
    %102 = arith.maximumf %101, %80 : vector<1x128xf32>
    %103 = arith.subf %101, %102 : vector<1x128xf32>
    %104 = math.exp %103 : vector<1x128xf32>
    %105 = arith.subf %80, %102 : vector<1x128xf32>
    %106 = math.exp %105 : vector<1x128xf32>
    %107 = arith.mulf %104, %75 : vector<1x128xf32>
    %108 = arith.mulf %106, %83 : vector<1x128xf32>
    %109 = arith.addf %107, %108 : vector<1x128xf32>
    %110 = arith.mulf %104, %77 : vector<1x128xf32>
    %111 = arith.addf %110, %106 : vector<1x128xf32>
    %c2_i32 = arith.constant 2 : i32
    %112 = arith.index_cast %c2_i32 : i32 to index
    %c0_49 = arith.constant 0 : index
    %c0_50 = arith.constant 0 : index
    %113 = vector.load %arg16[%112, %c0_49, %c0_50] : memref<8x1x128xf32, #tpu.memory_space<vmem>>, vector<1x1x128xf32>
    %114 = vector.shape_cast %113 : vector<1x1x128xf32> to vector<1x128xf32>
    %115 = arith.index_cast %c2_i32 : i32 to index
    %c0_51 = arith.constant 0 : index
    %c0_52 = arith.constant 0 : index
    %116 = vector.load %arg17[%115, %c0_51, %c0_52] : memref<8x1x128xf32, #tpu.memory_space<vmem>>, vector<1x1x128xf32>
    %117 = vector.shape_cast %116 : vector<1x1x128xf32> to vector<1x128xf32>
    %118 = arith.addf %37, %114 : vector<1x128xf32>
    %119 = arith.maximumf %102, %118 : vector<1x128xf32>
    %120 = arith.subf %102, %119 : vector<1x128xf32>
    %121 = math.exp %120 : vector<1x128xf32>
    %122 = arith.subf %118, %119 : vector<1x128xf32>
    %123 = math.exp %122 : vector<1x128xf32>
    %124 = arith.mulf %121, %109 : vector<1x128xf32>
    %125 = arith.mulf %123, %117 : vector<1x128xf32>
    %126 = arith.addf %124, %125 : vector<1x128xf32>
    %127 = arith.mulf %121, %111 : vector<1x128xf32>
    %128 = arith.addf %127, %123 : vector<1x128xf32>
    %129 = tpu.reciprocal %128 {approx = true} : vector<1x128xf32> -> vector<1x128xf32>
    %130 = arith.mulf %126, %129 : vector<1x128xf32>
    %131 = arith.index_cast %c2_i32 : i32 to index
    %c0_53 = arith.constant 0 : index
    %c0_54 = arith.constant 0 : index
    %132 = vector.load %arg18[%131, %c0_53, %c0_54] : memref<8x1x128xf32, #tpu.memory_space<vmem>>, vector<1x1x128xf32>
    %133 = vector.shape_cast %132 : vector<1x1x128xf32> to vector<1x128xf32>
    %134 = vector.shape_cast %130 : vector<1x128xf32> to vector<1x1x128xf32>
    tpu.vector_store %arg18[%131, %c0_53, %c0_54], %134 {strides = array<i32>} : memref<8x1x128xf32, #tpu.memory_space<vmem>>, vector<1x1x128xf32>,
    %135 = arith.subf %102, %36 : vector<1x128xf32>
    %136 = arith.maximumf %135, %114 : vector<1x128xf32>
    %137 = arith.subf %135, %136 : vector<1x128xf32>
    %138 = math.exp %137 : vector<1x128xf32>
    %139 = arith.subf %114, %136 : vector<1x128xf32>
    %140 = math.exp %139 : vector<1x128xf32>
    %141 = arith.mulf %138, %109 : vector<1x128xf32>
    %142 = arith.mulf %140, %117 : vector<1x128xf32>
    %143 = arith.addf %141, %142 : vector<1x128xf32>
    %144 = arith.mulf %138, %111 : vector<1x128xf32>
    %145 = arith.addf %144, %140 : vector<1x128xf32>
    %c3_i32 = arith.constant 3 : i32
    %146 = arith.index_cast %c3_i32 : i32 to index
    %c0_55 = arith.constant 0 : index
    %c0_56 = arith.constant 0 : index
    %147 = vector.load %arg16[%146, %c0_55, %c0_56] : memref<8x1x128xf32, #tpu.memory_space<vmem>>, vector<1x1x128xf32>
    %148 = vector.shape_cast %147 : vector<1x1x128xf32> to vector<1x128xf32>
    %149 = arith.index_cast %c3_i32 : i32 to index
    %c0_57 = arith.constant 0 : index
    %c0_58 = arith.constant 0 : index
    %150 = vector.load %arg17[%149, %c0_57, %c0_58] : memref<8x1x128xf32, #tpu.memory_space<vmem>>, vector<1x1x128xf32>
    %151 = vector.shape_cast %150 : vector<1x1x128xf32> to vector<1x128xf32>
    %152 = arith.addf %37, %148 : vector<1x128xf32>
    %153 = arith.maximumf %136, %152 : vector<1x128xf32>
    %154 = arith.subf %136, %153 : vector<1x128xf32>
    %155 = math.exp %154 : vector<1x128xf32>
    %156 = arith.subf %152, %153 : vector<1x128xf32>
    %157 = math.exp %156 : vector<1x128xf32>
    %158 = arith.mulf %155, %143 : vector<1x128xf32>
    %159 = arith.mulf %157, %151 : vector<1x128xf32>
    %160 = arith.addf %158, %159 : vector<1x128xf32>
    %161 = arith.mulf %155, %145 : vector<1x128xf32>
    %162 = arith.addf %161, %157 : vector<1x128xf32>
    %163 = tpu.reciprocal %162 {approx = true} : vector<1x128xf32> -> vector<1x128xf32>
    %164 = arith.mulf %160, %163 : vector<1x128xf32>
    %165 = arith.index_cast %c3_i32 : i32 to index
    %c0_59 = arith.constant 0 : index
    %c0_60 = arith.constant 0 : index
    %166 = vector.load %arg18[%165, %c0_59, %c0_60] : memref<8x1x128xf32, #tpu.memory_space<vmem>>, vector<1x1x128xf32>
    %167 = vector.shape_cast %166 : vector<1x1x128xf32> to vector<1x128xf32>
    %168 = vector.shape_cast %164 : vector<1x128xf32> to vector<1x1x128xf32>
    tpu.vector_store %arg18[%165, %c0_59, %c0_60], %168 {strides = array<i32>} : memref<8x1x128xf32, #tpu.memory_space<vmem>>, vector<1x1x128xf32>,
    %169 = arith.subf %136, %36 : vector<1x128xf32>
    %170 = arith.maximumf %169, %148 : vector<1x128xf32>
    %171 = arith.subf %169, %170 : vector<1x128xf32>
    %172 = math.exp %171 : vector<1x128xf32>
    %173 = arith.subf %148, %170 : vector<1x128xf32>
    %174 = math.exp %173 : vector<1x128xf32>
    %175 = arith.mulf %172, %143 : vector<1x128xf32>
    %176 = arith.mulf %174, %151 : vector<1x128xf32>
    %177 = arith.addf %175, %176 : vector<1x128xf32>
    %178 = arith.mulf %172, %145 : vector<1x128xf32>
    %179 = arith.addf %178, %174 : vector<1x128xf32>
    %c4_i32 = arith.constant 4 : i32
    %180 = arith.index_cast %c4_i32 : i32 to index
    %c0_61 = arith.constant 0 : index
    %c0_62 = arith.constant 0 : index
    %181 = vector.load %arg16[%180, %c0_61, %c0_62] : memref<8x1x128xf32, #tpu.memory_space<vmem>>, vector<1x1x128xf32>
    %182 = vector.shape_cast %181 : vector<1x1x128xf32> to vector<1x128xf32>
    %183 = arith.index_cast %c4_i32 : i32 to index
    %c0_63 = arith.constant 0 : index
    %c0_64 = arith.constant 0 : index
    %184 = vector.load %arg17[%183, %c0_63, %c0_64] : memref<8x1x128xf32, #tpu.memory_space<vmem>>, vector<1x1x128xf32>
    %185 = vector.shape_cast %184 : vector<1x1x128xf32> to vector<1x128xf32>
    %186 = arith.addf %37, %182 : vector<1x128xf32>
    %187 = arith.maximumf %170, %186 : vector<1x128xf32>
    %188 = arith.subf %170, %187 : vector<1x128xf32>
    %189 = math.exp %188 : vector<1x128xf32>
    %190 = arith.subf %186, %187 : vector<1x128xf32>
    %191 = math.exp %190 : vector<1x128xf32>
    %192 = arith.mulf %189, %177 : vector<1x128xf32>
    %193 = arith.mulf %191, %185 : vector<1x128xf32>
    %194 = arith.addf %192, %193 : vector<1x128xf32>
    %195 = arith.mulf %189, %179 : vector<1x128xf32>
    %196 = arith.addf %195, %191 : vector<1x128xf32>
    %197 = tpu.reciprocal %196 {approx = true} : vector<1x128xf32> -> vector<1x128xf32>
    %198 = arith.mulf %194, %197 : vector<1x128xf32>
    %199 = arith.index_cast %c4_i32 : i32 to index
    %c0_65 = arith.constant 0 : index
    %c0_66 = arith.constant 0 : index
    %200 = vector.load %arg18[%199, %c0_65, %c0_66] : memref<8x1x128xf32, #tpu.memory_space<vmem>>, vector<1x1x128xf32>
    %201 = vector.shape_cast %200 : vector<1x1x128xf32> to vector<1x128xf32>
    %202 = vector.shape_cast %198 : vector<1x128xf32> to vector<1x1x128xf32>
    tpu.vector_store %arg18[%199, %c0_65, %c0_66], %202 {strides = array<i32>} : memref<8x1x128xf32, #tpu.memory_space<vmem>>, vector<1x1x128xf32>,
    %203 = arith.subf %170, %36 : vector<1x128xf32>
    %204 = arith.maximumf %203, %182 : vector<1x128xf32>
    %205 = arith.subf %203, %204 : vector<1x128xf32>
    %206 = math.exp %205 : vector<1x128xf32>
    %207 = arith.subf %182, %204 : vector<1x128xf32>
    %208 = math.exp %207 : vector<1x128xf32>
    %209 = arith.mulf %206, %177 : vector<1x128xf32>
    %210 = arith.mulf %208, %185 : vector<1x128xf32>
    %211 = arith.addf %209, %210 : vector<1x128xf32>
    %212 = arith.mulf %206, %179 : vector<1x128xf32>
    %213 = arith.addf %212, %208 : vector<1x128xf32>
    %c5_i32 = arith.constant 5 : i32
    %214 = arith.index_cast %c5_i32 : i32 to index
    %c0_67 = arith.constant 0 : index
    %c0_68 = arith.constant 0 : index
    %215 = vector.load %arg16[%214, %c0_67, %c0_68] : memref<8x1x128xf32, #tpu.memory_space<vmem>>, vector<1x1x128xf32>
    %216 = vector.shape_cast %215 : vector<1x1x128xf32> to vector<1x128xf32>
    %217 = arith.index_cast %c5_i32 : i32 to index
    %c0_69 = arith.constant 0 : index
    %c0_70 = arith.constant 0 : index
    %218 = vector.load %arg17[%217, %c0_69, %c0_70] : memref<8x1x128xf32, #tpu.memory_space<vmem>>, vector<1x1x128xf32>
    %219 = vector.shape_cast %218 : vector<1x1x128xf32> to vector<1x128xf32>
    %220 = arith.addf %37, %216 : vector<1x128xf32>
    %221 = arith.maximumf %204, %220 : vector<1x128xf32>
    %222 = arith.subf %204, %221 : vector<1x128xf32>
    %223 = math.exp %222 : vector<1x128xf32>
    %224 = arith.subf %220, %221 : vector<1x128xf32>
    %225 = math.exp %224 : vector<1x128xf32>
    %226 = arith.mulf %223, %211 : vector<1x128xf32>
    %227 = arith.mulf %225, %219 : vector<1x128xf32>
    %228 = arith.addf %226, %227 : vector<1x128xf32>
    %229 = arith.mulf %223, %213 : vector<1x128xf32>
    %230 = arith.addf %229, %225 : vector<1x128xf32>
    %231 = tpu.reciprocal %230 {approx = true} : vector<1x128xf32> -> vector<1x128xf32>
    %232 = arith.mulf %228, %231 : vector<1x128xf32>
    %233 = arith.index_cast %c5_i32 : i32 to index
    %c0_71 = arith.constant 0 : index
    %c0_72 = arith.constant 0 : index
    %234 = vector.load %arg18[%233, %c0_71, %c0_72] : memref<8x1x128xf32, #tpu.memory_space<vmem>>, vector<1x1x128xf32>
    %235 = vector.shape_cast %234 : vector<1x1x128xf32> to vector<1x128xf32>
    %236 = vector.shape_cast %232 : vector<1x128xf32> to vector<1x1x128xf32>
    tpu.vector_store %arg18[%233, %c0_71, %c0_72], %236 {strides = array<i32>} : memref<8x1x128xf32, #tpu.memory_space<vmem>>, vector<1x1x128xf32>,
    %237 = arith.subf %204, %36 : vector<1x128xf32>
    %238 = arith.maximumf %237, %216 : vector<1x128xf32>
    %239 = arith.subf %237, %238 : vector<1x128xf32>
    %240 = math.exp %239 : vector<1x128xf32>
    %241 = arith.subf %216, %238 : vector<1x128xf32>
    %242 = math.exp %241 : vector<1x128xf32>
    %243 = arith.mulf %240, %211 : vector<1x128xf32>
    %244 = arith.mulf %242, %219 : vector<1x128xf32>
    %245 = arith.addf %243, %244 : vector<1x128xf32>
    %246 = arith.mulf %240, %213 : vector<1x128xf32>
    %247 = arith.addf %246, %242 : vector<1x128xf32>
    %c6_i32 = arith.constant 6 : i32
    %248 = arith.index_cast %c6_i32 : i32 to index
    %c0_73 = arith.constant 0 : index
    %c0_74 = arith.constant 0 : index
    %249 = vector.load %arg16[%248, %c0_73, %c0_74] : memref<8x1x128xf32, #tpu.memory_space<vmem>>, vector<1x1x128xf32>
    %250 = vector.shape_cast %249 : vector<1x1x128xf32> to vector<1x128xf32>
    %251 = arith.index_cast %c6_i32 : i32 to index
    %c0_75 = arith.constant 0 : index
    %c0_76 = arith.constant 0 : index
    %252 = vector.load %arg17[%251, %c0_75, %c0_76] : memref<8x1x128xf32, #tpu.memory_space<vmem>>, vector<1x1x128xf32>
    %253 = vector.shape_cast %252 : vector<1x1x128xf32> to vector<1x128xf32>
    %254 = arith.addf %37, %250 : vector<1x128xf32>
    %255 = arith.maximumf %238, %254 : vector<1x128xf32>
    %256 = arith.subf %238, %255 : vector<1x128xf32>
    %257 = math.exp %256 : vector<1x128xf32>
    %258 = arith.subf %254, %255 : vector<1x128xf32>
    %259 = math.exp %258 : vector<1x128xf32>
    %260 = arith.mulf %257, %245 : vector<1x128xf32>
    %261 = arith.mulf %259, %253 : vector<1x128xf32>
    %262 = arith.addf %260, %261 : vector<1x128xf32>
    %263 = arith.mulf %257, %247 : vector<1x128xf32>
    %264 = arith.addf %263, %259 : vector<1x128xf32>
    %265 = tpu.reciprocal %264 {approx = true} : vector<1x128xf32> -> vector<1x128xf32>
    %266 = arith.mulf %262, %265 : vector<1x128xf32>
    %267 = arith.index_cast %c6_i32 : i32 to index
    %c0_77 = arith.constant 0 : index
    %c0_78 = arith.constant 0 : index
    %268 = vector.load %arg18[%267, %c0_77, %c0_78] : memref<8x1x128xf32, #tpu.memory_space<vmem>>, vector<1x1x128xf32>
    %269 = vector.shape_cast %268 : vector<1x1x128xf32> to vector<1x128xf32>
    %270 = vector.shape_cast %266 : vector<1x128xf32> to vector<1x1x128xf32>
    tpu.vector_store %arg18[%267, %c0_77, %c0_78], %270 {strides = array<i32>} : memref<8x1x128xf32, #tpu.memory_space<vmem>>, vector<1x1x128xf32>,
    %271 = arith.subf %238, %36 : vector<1x128xf32>
    %272 = arith.maximumf %271, %250 : vector<1x128xf32>
    %273 = arith.subf %271, %272 : vector<1x128xf32>
    %274 = math.exp %273 : vector<1x128xf32>
    %275 = arith.subf %250, %272 : vector<1x128xf32>
    %276 = math.exp %275 : vector<1x128xf32>
    %277 = arith.mulf %274, %245 : vector<1x128xf32>
    %278 = arith.mulf %276, %253 : vector<1x128xf32>
    %279 = arith.addf %277, %278 : vector<1x128xf32>
    %280 = arith.mulf %274, %247 : vector<1x128xf32>
    %281 = arith.addf %280, %276 : vector<1x128xf32>
    %c7_i32 = arith.constant 7 : i32
    %282 = arith.index_cast %c7_i32 : i32 to index
    %c0_79 = arith.constant 0 : index
    %c0_80 = arith.constant 0 : index
    %283 = vector.load %arg16[%282, %c0_79, %c0_80] : memref<8x1x128xf32, #tpu.memory_space<vmem>>, vector<1x1x128xf32>
    %284 = vector.shape_cast %283 : vector<1x1x128xf32> to vector<1x128xf32>
    %285 = arith.index_cast %c7_i32 : i32 to index
    %c0_81 = arith.constant 0 : index
    %c0_82 = arith.constant 0 : index
    %286 = vector.load %arg17[%285, %c0_81, %c0_82] : memref<8x1x128xf32, #tpu.memory_space<vmem>>, vector<1x1x128xf32>
    %287 = vector.shape_cast %286 : vector<1x1x128xf32> to vector<1x128xf32>
    %288 = arith.addf %37, %284 : vector<1x128xf32>
    %289 = arith.maximumf %272, %288 : vector<1x128xf32>
    %290 = arith.subf %272, %289 : vector<1x128xf32>
    %291 = math.exp %290 : vector<1x128xf32>
    %292 = arith.subf %288, %289 : vector<1x128xf32>
    %293 = math.exp %292 : vector<1x128xf32>
    %294 = arith.mulf %291, %279 : vector<1x128xf32>
    %295 = arith.mulf %293, %287 : vector<1x128xf32>
    %296 = arith.addf %294, %295 : vector<1x128xf32>
    %297 = arith.mulf %291, %281 : vector<1x128xf32>
    %298 = arith.addf %297, %293 : vector<1x128xf32>
    %299 = tpu.reciprocal %298 {approx = true} : vector<1x128xf32> -> vector<1x128xf32>
    %300 = arith.mulf %296, %299 : vector<1x128xf32>
    %301 = arith.index_cast %c7_i32 : i32 to index
    %c0_83 = arith.constant 0 : index
    %c0_84 = arith.constant 0 : index
    %302 = vector.load %arg18[%301, %c0_83, %c0_84] : memref<8x1x128xf32, #tpu.memory_space<vmem>>, vector<1x1x128xf32>
    %303 = vector.shape_cast %302 : vector<1x1x128xf32> to vector<1x128xf32>
    %304 = vector.shape_cast %300 : vector<1x128xf32> to vector<1x1x128xf32>
    tpu.vector_store %arg18[%301, %c0_83, %c0_84], %304 {strides = array<i32>} : memref<8x1x128xf32, #tpu.memory_space<vmem>>, vector<1x1x128xf32>,
    %305 = arith.subf %272, %36 : vector<1x128xf32>
    %306 = arith.maximumf %305, %284 : vector<1x128xf32>
    %307 = arith.subf %305, %306 : vector<1x128xf32>
    %308 = math.exp %307 : vector<1x128xf32>
    %309 = arith.subf %284, %306 : vector<1x128xf32>
    %310 = math.exp %309 : vector<1x128xf32>
    %311 = arith.mulf %308, %279 : vector<1x128xf32>
    %312 = arith.mulf %310, %287 : vector<1x128xf32>
    %313 = arith.addf %311, %312 : vector<1x128xf32>
    %314 = arith.mulf %308, %281 : vector<1x128xf32>
    %315 = arith.addf %314, %310 : vector<1x128xf32>
    %c8_i32 = arith.constant 8 : i32
    %c0_85 = arith.constant 0 : index
    %c256 = arith.constant 256 : index
    %316 = vector.load %arg15[%c0_85, %c256] : memref<8x384xf32, #tpu.memory_space<vmem>>, vector<8x32xf32>
    %317 = arith.negf %316 : vector<8x32xf32>
    %318 = math.exp %317 : vector<8x32xf32>
    %cst_86 = arith.constant 1.000000e+00 : f32
    %319 = vector.broadcast %cst_86 : f32 to vector<8x32xf32>
    %320 = arith.addf %319, %318 : vector<8x32xf32>
    %321 = arith.divf %319, %320 : vector<8x32xf32>
    %c0_87 = arith.constant 0 : index
    %c0_88 = arith.constant 0 : index
    %c0_89 = arith.constant 0 : index
    %322 = vector.load %arg18[%c0_87, %c0_88, %c0_89] : memref<8x1x128xf32, #tpu.memory_space<vmem>>, vector<8x1x128xf32>
    %323 = vector.shape_cast %322 : vector<8x1x128xf32> to vector<8x128xf32>
    %324 = vector.extract_strided_slice %323 {offsets = [0, 0], sizes = [8, 32], strides = [1, 1]} : vector<8x128xf32> to vector<8x32xf32>
    %325 = arith.mulf %321, %324 : vector<8x32xf32>
    %326 = arith.truncf %325 : vector<8x32xf32> to vector<8x32xbf16>
    %c0_90 = arith.constant 0 : index
    %c0_91 = arith.constant 0 : index
    %327 = vector.load %arg5[%c0_90, %c0_91] : memref<32x32xbf16, #tpu.memory_space<vmem>>, vector<32x32xbf16>
    %cst_92 = arith.constant dense<0.000000e+00> : vector<8x32xf32>
    %328 = tpu.matmul %326, %327, %cst_92 {dimension_numbers = #tpu.dot_dimension_numbers<[1], [0], [0], [1], [0, 0, 1, 1], [], []>} : vector<8x32xbf16>, vector<32x32xbf16>, vector<8x32xf32> -> vector<8x32xf32>
    %329 = arith.addf %1, %328 : vector<8x32xf32>
    %330 = arith.truncf %329 : vector<8x32xf32> to vector<8x32xbf16>
    %c0_93 = arith.constant 0 : index
    %c0_94 = arith.constant 0 : index
    %c0_95 = arith.constant 0 : index
    %331 = vector.load %arg11[%c0_93, %c0_94, %c0_95] : memref<1x8x32xbf16, #tpu.memory_space<vmem>>, vector<1x8x32xbf16>
    %332 = vector.shape_cast %331 : vector<1x8x32xbf16> to vector<8x32xbf16>
    %333 = vector.shape_cast %330 : vector<8x32xbf16> to vector<1x8x32xbf16>
    tpu.vector_store %arg11[%c0_93, %c0_94, %c0_95], %333 {strides = array<i32>} : memref<1x8x32xbf16, #tpu.memory_space<vmem>>, vector<1x8x32xbf16>,
    %c0_96 = arith.constant 0 : index
    %c0_97 = arith.constant 0 : index
    %c0_98 = arith.constant 0 : index
    %334 = vector.load %arg12[%c0_96, %c0_97, %c0_98] : memref<1x1x128xf32, #tpu.memory_space<vmem>>, vector<1x1x128xf32>
    %335 = vector.shape_cast %334 : vector<1x1x128xf32> to vector<1x128xf32>
    %336 = vector.shape_cast %313 : vector<1x128xf32> to vector<1x1x128xf32>
    tpu.vector_store %arg12[%c0_96, %c0_97, %c0_98], %336 {strides = array<i32>} : memref<1x1x128xf32, #tpu.memory_space<vmem>>, vector<1x1x128xf32>,
    %c0_99 = arith.constant 0 : index
    %c0_100 = arith.constant 0 : index
    %c0_101 = arith.constant 0 : index
    %337 = vector.load %arg13[%c0_99, %c0_100, %c0_101] : memref<1x1x128xf32, #tpu.memory_space<vmem>>, vector<1x1x128xf32>
    %338 = vector.shape_cast %337 : vector<1x1x128xf32> to vector<1x128xf32>
    %339 = vector.shape_cast %315 : vector<1x128xf32> to vector<1x1x128xf32>
    tpu.vector_store %arg13[%c0_99, %c0_100, %c0_101], %339 {strides = array<i32>} : memref<1x1x128xf32, #tpu.memory_space<vmem>>, vector<1x1x128xf32>,
    %c0_102 = arith.constant 0 : index
    %c0_103 = arith.constant 0 : index
    %c0_104 = arith.constant 0 : index
    %340 = vector.load %arg14[%c0_102, %c0_103, %c0_104] : memref<1x1x128xf32, #tpu.memory_space<vmem>>, vector<1x1x128xf32>
    %341 = vector.shape_cast %340 : vector<1x1x128xf32> to vector<1x128xf32>
    %342 = vector.shape_cast %306 : vector<1x128xf32> to vector<1x1x128xf32>
    tpu.vector_store %arg14[%c0_102, %c0_103, %c0_104], %342 {strides = array<i32>} : memref<1x1x128xf32, #tpu.memory_space<vmem>>, vector<1x1x128xf32>,
    return
  }
  func.func @transform_0(%arg0: i32) -> (i32, i32, i32) {
    %c0_i32 = arith.constant 0 : i32
    %c0_i32_0 = arith.constant 0 : i32
    %c0_i32_1 = arith.constant 0 : i32
    return %arg0, %c0_i32, %c0_i32_0 : i32, i32, i32
  }
  func.func @transform_1(%arg0: i32) -> (i32, i32) {
    %c0_i32 = arith.constant 0 : i32
    %c0_i32_0 = arith.constant 0 : i32
    %c0_i32_1 = arith.constant 0 : i32
    return %c0_i32, %c0_i32_0 : i32, i32
  }
  func.func @transform_2(%arg0: i32) -> (i32, i32) {
    %c0_i32 = arith.constant 0 : i32
    %c0_i32_0 = arith.constant 0 : i32
    %c0_i32_1 = arith.constant 0 : i32
    return %c0_i32, %c0_i32_0 : i32, i32
  }
  func.func @transform_3(%arg0: i32) -> (i32, i32) {
    %c0_i32 = arith.constant 0 : i32
    %c0_i32_0 = arith.constant 0 : i32
    %c0_i32_1 = arith.constant 0 : i32
    return %c0_i32, %c0_i32_0 : i32, i32
  }
  func.func @transform_4(%arg0: i32) -> (i32, i32) {
    %c0_i32 = arith.constant 0 : i32
    %c0_i32_0 = arith.constant 0 : i32
    %c0_i32_1 = arith.constant 0 : i32
    return %c0_i32, %c0_i32_0 : i32, i32
  }
  func.func @transform_5(%arg0: i32) -> (i32, i32) {
    %c0_i32 = arith.constant 0 : i32
    %c0_i32_0 = arith.constant 0 : i32
    %c0_i32_1 = arith.constant 0 : i32
    return %c0_i32, %c0_i32_0 : i32, i32
  }
  func.func @transform_6(%arg0: i32) -> (i32, i32) {
    %c0_i32 = arith.constant 0 : i32
    %c0_i32_0 = arith.constant 0 : i32
    %c0_i32_1 = arith.constant 0 : i32
    return %c0_i32, %c0_i32_0 : i32, i32
  }
  func.func @transform_7(%arg0: i32) -> (i32, i32, i32) {
    %c0_i32 = arith.constant 0 : i32
    %c0_i32_0 = arith.constant 0 : i32
    %c0_i32_1 = arith.constant 0 : i32
    return %arg0, %c0_i32, %c0_i32_0 : i32, i32, i32
  }
  func.func @transform_8(%arg0: i32) -> (i32, i32, i32) {
    %c0_i32 = arith.constant 0 : i32
    %c0_i32_0 = arith.constant 0 : i32
    %c0_i32_1 = arith.constant 0 : i32
    return %arg0, %c0_i32, %c0_i32_0 : i32, i32, i32
  }
  func.func @transform_9(%arg0: i32) -> (i32, i32, i32) {
    %c0_i32 = arith.constant 0 : i32
    %c0_i32_0 = arith.constant 0 : i32
    %c0_i32_1 = arith.constant 0 : i32
    return %arg0, %c0_i32, %c0_i32_0 : i32, i32, i32
  }
  func.func @transform_10(%arg0: i32) -> (i32, i32, i32) {
    %c0_i32 = arith.constant 0 : i32
    %c0_i32_0 = arith.constant 0 : i32
    %c0_i32_1 = arith.constant 0 : i32
    return %arg0, %c0_i32, %c0_i32_0 : i32, i32, i32
  }
  func.func @transform_11(%arg0: i32) -> (i32, i32, i32) {
    %c0_i32 = arith.constant 0 : i32
    %c0_i32_0 = arith.constant 0 : i32
    %c0_i32_1 = arith.constant 0 : i32
    return %arg0, %c0_i32, %c0_i32_0 : i32, i32, i32
  }
  func.func @transform_12(%arg0: i32) -> (i32, i32, i32) {
    %c0_i32 = arith.constant 0 : i32
    %c0_i32_0 = arith.constant 0 : i32
    %c0_i32_1 = arith.constant 0 : i32
    return %arg0, %c0_i32, %c0_i32_0 : i32, i32, i32
  }
  func.func @transform_13(%arg0: i32) -> (i32, i32, i32) {
    %c0_i32 = arith.constant 0 : i32
    %c0_i32_0 = arith.constant 0 : i32
    %c0_i32_1 = arith.constant 0 : i32
    return %arg0, %c0_i32, %c0_i32_0 : i32, i32, i32
  }
}

</mosaic_0001>

<bundles_post_ra>
// kernel: tpu_custom_call.1
= control target key start
LH: loop header
LB: loop body
LE: loop exit
PB: predicated region body
PF: predicated region fallthrough
CT: control target
= control target key end

     0   :  { %s3281_s0 = inlined_call_operand.hbm [shape: f32[2,8,32], index: 0, kind: input, shape index: {}]   ;;  %s3282_s1 = inlined_call_operand.hbm [shape: f32[1,32], index: 1, kind: input, shape index: {}]   ;;  %s3283_s2 = inlined_call_operand.hbm [shape: f32[1,32], index: 2, kind: input, shape index: {}]   ;;  %s3284_s3 = inlined_call_operand.hbm [shape: bf16[32,384], index: 3, kind: input, shape index: {}]   ;;  %s3285_s4 = inlined_call_operand.hbm [shape: bf16[32,32], index: 4, kind: input, shape index: {}]   ;;  %s3286_s5 = inlined_call_operand.hbm [shape: f32[1,128], index: 5, kind: input, shape index: {}]   ;;  %s3287_s6 = inlined_call_operand.hbm [shape: f32[1,128], index: 6, kind: input, shape index: {}]   ;;  %s3288_s7 = inlined_call_operand.hbm [shape: f32[2,1,128], index: 7, kind: input, shape index: {}]   ;;  %s3289_s8 = inlined_call_operand.hbm [shape: f32[2,1,128], index: 8, kind: input, shape index: {}]   ;;  %s3290_s9 = inlined_call_operand.hbm [shape: f32[2,1,128], index: 9, kind: input, shape index: {}]   ;;  %s3291_s10 = inlined_call_operand.hbm [shape: bf16[2,8,32], index: 10, kind: output, shape index: {0}]   ;;  %s3292_s11 = inlined_call_operand.hbm [shape: f32[2,1,128], index: 11, kind: output, shape index: {1}]   ;;  %s3293_s12 = inlined_call_operand.hbm [shape: f32[2,1,128], index: 12, kind: output, shape index: {2}]   ;;  %s3294_s13 = inlined_call_operand.hbm [shape: f32[2,1,128], index: 13, kind: output, shape index: {3}]  }
   0x1   :  { %3321 = sst [smem:[#allocation45_spill]] %s3282_s1 }
   0x2   :  { %3322 = sst [smem:[#allocation46_spill]] %s3283_s2 }
   0x3   :  { %3323 = sst [smem:[#allocation47_spill]] %s3284_s3 }
   0x4   :  { %3324 = sst [smem:[#allocation48_spill]] %s3286_s5 }
   0x5   :  { %3325 = sst [smem:[#allocation49_spill]] %s3288_s7 }
   0x6   :  { %3326 = sst [smem:[#allocation50_spill]] %s3291_s10 }
   0x7   :  { %3327 = sst [smem:[#allocation51_spill]] %s3292_s11 }
   0x8   :  { %3328 = sst [smem:[#allocation52_spill]] %s3293_s12 }
   0x9   :  { %3329 = sst [smem:[#allocation53_spill]] %s3294_s13 }
   0xa   :  { %19 = vsyncpa [#allocation7], 0 }
   0xb   :  { %21 = vsyncpa [#allocation7 + $0x1], 0 }
   0xc   :  { %22 = vsyncpa [#allocation10], 0 }
   0xd   :  { %23 = vsyncpa [#allocation13], 0 }
   0xe   :  { %24 = vsyncpa [#allocation16], 0 }
   0xf   :  { %25 = vsyncpa [#allocation19], 0 }
  0x10   :  { %27 = vsyncpa [#allocation19 + $0x1], 0 }
  0x11   :  { %28 = vsyncpa [#allocation22], 0 }
  0x12   :  { %30 = vsyncpa [#allocation22 + $0x1], 0 }
  0x13   :  { %31 = vsyncpa [#allocation8], 0 }
  0x14   :  { %33 = vsyncpa [#allocation8 + $0x1], 0 }
  0x15   :  { %34 = vsyncpa [#allocation25], 0 }
  0x16   :  { %36 = vsyncpa [#allocation25 + $0x1], 0 }
  0x17   :  { %37 = vsyncpa [#allocation28], 0 }
  0x18   :  { %39 = vsyncpa [#allocation28 + $0x1], 0  ;;  %s2574_s25 = smov 0   ;;  %s2576_s26 = smov 0  }
  0x19   :  { %s2578_s27 = smov 0   ;;  %s2580_s28 = smov 0  }
  0x1a LB: > { %3330 = sst [smem:[#allocation38_spill]] %s2468_s25  ;;  %s2482_s29 = smov [#allocation9]   ;;  %s2480_s28 = sphi %s2580_s28, %s3377_s28   ;;  %s2476_s27 = sphi %s2578_s27, %s3379_s27   ;;  %s2472_s26 = sphi %s2576_s26, %s3381_s26   ;;  %s2468_s25 = sphi %s2574_s25, %s3380_s25  }
  0x1b   : > { %3331 = sst [smem:[#allocation39_spill]] %s2476_s27  ;;  %s397_s30 = sshll.u32 %s2482_s29, 4  ;;  %s2600_s30 = int_to_ptr.vmem [resolvable:$true] %s397_s30 }
  0x1c   : > { %s2595_s14 = sadd.s32 4294967295, %s2480_s28   ;;  %p1700_p0 = scmp.ge.s32.totalorder %s2480_s28, 1 }
  0x1d   : > { %3332 = sst [smem:[#allocation40_spill]] %s2595_s14  ;;  %p3305_p1 = scmp.eq.s32.totalorder %s2595_s14, 0 }
  0x1e   : > { %p384_p2 = scmp.lt.s32.totalorder %s2480_s28, 3  ;;  %s2483_s16 = smov [#allocation12]  }
  0x1f   : > { %s418_s17 = sshll.u32 %s2483_s16, 4  ;;  %s2484_s19 = smov [#allocation15]   ;;  %s2609_s17 = int_to_ptr.vmem [resolvable:$true] %s418_s17 }
  0x20   : > { %p2602_p3 = pnand %p1700_p0, %p384_p2  ;;  %s445_s20 = sshll.u32 %s2484_s19, 4  ;;  %s2617_s20 = int_to_ptr.vmem [resolvable:$true] %s445_s20 }
  0x21   : > { %s3335_s1 = sld [smem:[#allocation45_spill]] }
  0x22   : > { %s3333_s15 = scalar_select %p2602_p3, 1, 0 }
  0x23   : > { %p1813_p5 = pneg %p2602_p3 }
  0x25   : > { %p2613_p6 = pnand %p1813_p5, %p3305_p1 }
  0x27   : > { %s3334_s18 = scalar_select %p2613_p6, 1, 0 }
  0x28   : > { %s2014_s23 = scalar_lea.hbm %s3335_s1, 16  ;;  %p2627_p8 = pneg %p2613_p6 }
  0x29   : > { %p2015_p7 = scmp.ne.s32.totalorder %s3335_s1, %s2014_s23  ;;  %p2021_p11 = scmp.lt.u32.totalorder %s2014_s23, %s3335_s1 }
  0x2a   : > { %s3336_s16 = scalar_select %p2627_p8, 1, 0 }
  0x2b   : > { %p2017_p9 = pnand %p2627_p8, %p2015_p7 }
  0x2d   : > { %p2018_p10 = pneg %p2017_p9 }
  0x2f   : > { %p2023_p12 = pnand %p2021_p11, %p2018_p10 }
  0x31   : > { %2026 = shalt.err (!%p2023_p12)
}
  0x32   : > { %s2027_s21 = scalar_lea.vmem %s2600_s30, 16  ;;  %s2034_s22 = scalar_lea.vmem %s2600_s30, 32 }
  0x33   : > { %p2028_p13 = scmp.ne.s32.totalorder %s2600_s30, %s2027_s21  ;;  %p2035_p5 = scmp.lt.s32.totalorder %s2600_s30, %s2600_s30 }
  0x34   : > { %p2036_p7 = scmp.lt.s32.totalorder %s2034_s22, %s2027_s21 }
  0x35   : > { %p2030_p0 = pnand %p2028_p13, %p2627_p8 }
  0x36   : > { %p2037_p9 = por %p2036_p7, %p2035_p5 }
  0x37   : > { %p2031_p2 = pneg %p2030_p0 }
  0x39   : > { %p2038_p4 = pnand %p2037_p9, %p2031_p2 }
  0x3b   : > { %2041 = shalt.err (!%p2038_p4)
}
  0x3c   : > { %1816 = dma.hbm_to_vmem [thread:$0]  (!%p2613_p6), %s3335_s1, 16, %s2600_s30, [#allocation10]  }
  0x3d   : > { %s3337_s3 = sld [smem:[#allocation47_spill]] }
  0x43   : > { %s2042_s19 = scalar_lea.hbm %s3337_s3, 768 }
  0x44   : > { %p2043_p10 = scmp.ne.s32.totalorder %s3337_s3, %s2042_s19  ;;  %p2049_p4 = scmp.lt.u32.totalorder %s2042_s19, %s3337_s3 }
  0x46   : > { %p2045_p11 = pnand %p2043_p10, %p2627_p8 }
  0x48   : > { %p2046_p12 = pneg %p2045_p11 }
  0x4a   : > { %p2051_p13 = pnand %p2049_p4, %p2046_p12 }
  0x4c   : > { %2054 = shalt.err (!%p2051_p13)
}
  0x4d   : > { %s2055_s30 = scalar_lea.vmem %s2609_s17, 768  ;;  %p2063_p7 = scmp.lt.s32.totalorder %s2609_s17, %s2609_s17 }
  0x4e   : > { %p2056_p0 = scmp.ne.s32.totalorder %s2609_s17, %s2055_s30  ;;  %p2064_p9 = scmp.lt.s32.totalorder %s2055_s30, %s2055_s30 }
  0x50   : > { %p2058_p2 = pnand %p2056_p0, %p2627_p8  ;;  %p2065_p10 = por %p2064_p9, %p2063_p7 }
  0x52   : > { %p2059_p5 = pneg %p2058_p2 }
  0x54   : > { %p2066_p11 = pnand %p2065_p10, %p2059_p5 }
  0x56   : > { %2069 = shalt.err (!%p2066_p11)
}
  0x57   : > { %s2485_s12 = smov 192   ;;  %s2486_s13 = smov 12  }
  0x58   : > { %1822 = dma.hbm_to_vmem [thread:$0]  (!%p2613_p6), %s3337_s3, 768, %s2609_s17, [#allocation13], %s2485_s12, %s2485_s12, %s2486_s13  }
  0x59   : > { %s3338_s5 = sld [smem:[#allocation48_spill]] }
  0x5f   : > { %s2070_s19 = scalar_lea.hbm %s3338_s5, 16 }
  0x60   : > { %p2071_p12 = scmp.ne.s32.totalorder %s3338_s5, %s2070_s19  ;;  %p2077_p0 = scmp.lt.u32.totalorder %s2070_s19, %s3338_s5 }
  0x62   : > { %p2073_p4 = pnand %p2071_p12, %p2627_p8 }
  0x64   : > { %p2074_p13 = pneg %p2073_p4 }
  0x66   : > { %p2079_p2 = pnand %p2077_p0, %p2074_p13 }
  0x68   : > { %2082 = shalt.err (!%p2079_p2)
}
  0x69   : > { %s2083_s17 = scalar_lea.vmem %s2617_s20, 16  ;;  %s2090_s12 = scalar_lea.vmem %s2617_s20, 32 }
  0x6a   : > { %p2084_p5 = scmp.ne.s32.totalorder %s2617_s20, %s2083_s17  ;;  %p2091_p10 = scmp.lt.s32.totalorder %s2617_s20, %s2617_s20 }
  0x6b   : > { %p2092_p11 = scmp.lt.s32.totalorder %s2090_s12, %s2083_s17 }
  0x6c   : > { %p2086_p7 = pnand %p2084_p5, %p2627_p8 }
  0x6d   : > { %p2093_p12 = por %p2092_p11, %p2091_p10 }
  0x6e   : > { %p2087_p9 = pneg %p2086_p7 }
  0x70   : > { %p2094_p4 = pnand %p2093_p12, %p2087_p9 }
  0x72   : > { %2097 = shalt.err (!%p2094_p4)
}
  0x73   : > { %1828 = dma.hbm_to_vmem [thread:$0]  (!%p2613_p6), %s3338_s5, 16, %s2617_s20, [#allocation16]  }
  0x74   : > { %s3299_s10 = sadd.s32 4294967294, %s2480_s28   ;;  %s2698_s23 = sadd.s32 1, %s2480_s28  }
  0x75   : > { %3339 = sst [smem:[#allocation41_spill]] %s2698_s23  ;;  %s52_s24 = sadd.s32 1, %s2476_s27 }
  0x76   : > { %s49_s29 = ssub.s32 %s2480_s28, %s2698_s23  ;;  %p59_p13 = scmp.ne.s32.totalorder %s2476_s27, %s2472_s26 }
  0x77   : > { %p50_p0 = scmp.eq.s32.totalorder %s49_s29, 0  ;;  %p60_p2 = scmp.eq.s32.totalorder %s2480_s28, 0 }
  0x78   : > { %p65_p5 = scmp.ne.s32.totalorder %s2472_s26, %s2468_s25  ;;  %p293_p7 = scmp.eq.s32.totalorder %s2595_s14, 1 }
  0x79   : > { %s2710_s19 = scalar_select %p50_p0, %s2476_s27, %s52_s24  }
  0x7a   : > { %p61_p9 = por %p60_p2, %p59_p13  ;;  %p2714_p10 = por %p3305_p1, %p65_p5 }
  0x7b   : > { %3340 = sst [smem:[#allocation42_spill]] %s2710_s19  ;;  %p2718_p11 = por %p293_p7, %p59_p13 }
  0x7c   : > { %s3341_s20 = scalar_select %p2714_p10, 1, 0 }
  0x7d   : > { %s3342_s21 = scalar_select %p2718_p11, 1, 0 }
  0x7e   : > { %p299_p12 = scmp.eq.s32.totalorder %s3299_s10, 1  ;;  %p1864_p4 = scmp.lt.s32.totalorder %s2480_s28, 2 }
  0x7f   : > { %3343 = sst [smem:[#allocation43_spill]] %s3342_s21  ;;  %s2726_s22 = sand.u32 1, %s2476_s27  }
  0x80   : > { %p2728_p3 = por %p299_p12, %p65_p5  ;;  %s485_s17 = sand.u32 1, %s2480_s28  }
  0x81   : > { %p2733_p0 = pnand %p1864_p4, %p61_p9  ;;  %s2738_s1 = sshll.u32 %s2480_s28, 4 }
  0x82   : > { %s3344_s30 = scalar_select %p2728_p3, 1, 0 }
  0x83   : > { %s3346_s12 = scalar_select %p2733_p0, 1, 0 }
  0x84   : > { %3345 = sst [smem:[#allocation44_spill]] %s3344_s30  ;;  %s3347_s7 = sld [smem:[#allocation49_spill]] }
  0x85   : > { %s488_s10 = scalar_lea.vmem [#allocation18], %s2726_s22  ;;  %s2487_s5 = smov [#allocation11]  }
  0x86   : > { %s495_s3 = sshll.u32 %s488_s10, 4  ;;  %s2749_s19 = sshll.u32 %s2487_s5, 4  ;;  %s2747_s3 = int_to_ptr.vmem [resolvable:$true] %s495_s3  ;;  %s409_s19 = int_to_ptr.vmem [resolvable:$true] %s2749_s19 }
  0x87   : > { %s2751_s27 = scalar_lea.sflag [#allocation19], %s485_s17  ;;  %p2757_p2 = pneg %p2733_p0 }
  0x89   : > { %s3348_s13 = scalar_select %p2757_p2, 1, 0 }
  0x8a   : > { %s2744_s29 = scalar_lea.hbm %s3347_s7, %s2738_s1  ;;  %s2103_s30 = scalar_lea.hbm %s3347_s7, 32 }
  0x8b   : > { %s2098_s23 = scalar_lea.hbm %s2744_s29, 16  ;;  %p2104_p9 = scmp.lt.u32.totalorder %s2744_s29, %s3347_s7 }
  0x8c   : > { %p2099_p13 = scmp.ne.s32.totalorder %s2744_s29, %s2098_s23  ;;  %p2105_p12 = scmp.lt.u32.totalorder %s2103_s30, %s2098_s23 }
  0x8d   : > { %p2107_p1 = scmp.lt.u32.totalorder %s2098_s23, %s2744_s29 }
  0x8e   : > { %p2101_p5 = pnand %p2757_p2, %p2099_p13  ;;  %p2106_p4 = por %p2105_p12, %p2104_p9 }
  0x90   : > { %p2102_p7 = pneg %p2101_p5  ;;  %p2108_p3 = por %p2107_p1, %p2106_p4 }
  0x92   : > { %p2109_p11 = pnand %p2108_p3, %p2102_p7 }
  0x94   : > { %2112 = shalt.err (!%p2109_p11)
}
  0x95   : > { %s2113_s17 = scalar_lea.vmem %s2747_s3, 16  ;;  %s2488_s24 = smov [#allocation18]  }
  0x96   : > { %p2114_p13 = scmp.ne.s32.totalorder %s2747_s3, %s2113_s17  ;;  %s2118_s10 = sshll.u32 %s2488_s24, 4  ;;  %s2119_s10 = int_to_ptr.vmem [resolvable:$false] %s2118_s10 }
  0x97   : > { %s2120_s25 = scalar_lea.vmem %s2119_s10, 32  ;;  %p2121_p6 = scmp.lt.s32.totalorder %s2747_s3, %s2119_s10 }
  0x98   : > { %p2116_p5 = pnand %p2114_p13, %p2757_p2  ;;  %p2122_p8 = scmp.lt.s32.totalorder %s2120_s25, %s2113_s17 }
  0x9a   : > { %p2117_p10 = pneg %p2116_p5  ;;  %p2123_p9 = por %p2122_p8, %p2121_p6 }
  0x9c   : > { %p2124_p12 = pnand %p2123_p9, %p2117_p10 }
  0x9e   : > { %2127 = shalt.err (!%p2124_p12)
}
  0x9f   : > { %1838 = dma.hbm_to_vmem [thread:$0]  (!%p2733_p0), %s2744_s29, 16, %s2747_s3, %s2751_s27  }
  0xa0   : > { %s3349_s2 = sld [smem:[#allocation46_spill]]  ;;  %p3350_p3 = scmp.ne.s32.totalorder %s3336_s16, 0 }
  0xa6   : > { %s2128_s5 = scalar_lea.hbm %s3349_s2, 16 }
  0xa7   : > { %p2129_p1 = scmp.ne.s32.totalorder %s3349_s2, %s2128_s5  ;;  %p2135_p10 = scmp.lt.u32.totalorder %s2128_s5, %s3349_s2 }
  0xa9   : > { %p2131_p6 = pnand %p2129_p1, %p3350_p3 }
  0xab   : > { %p2132_p8 = pneg %p2131_p6 }
  0xad   : > { %p2137_p11 = pnand %p2135_p10, %p2132_p8 }
  0xaf   : > { %2140 = shalt.err (!%p2137_p11)
}
  0xb0   : > { %s2141_s25 = scalar_lea.vmem %s409_s19, 16  ;;  %s2148_s3 = scalar_lea.vmem %s409_s19, 32 }
  0xb1   : > { %p2142_p7 = scmp.ne.s32.totalorder %s409_s19, %s2141_s25  ;;  %p2149_p5 = scmp.lt.s32.totalorder %s409_s19, %s409_s19 }
  0xb2   : > { %p2150_p9 = scmp.lt.s32.totalorder %s2148_s3, %s2141_s25 }
  0xb3   : > { %p2144_p4 = pnand %p2142_p7, %p3350_p3 }
  0xb4   : > { %p2151_p12 = por %p2150_p9, %p2149_p5 }
  0xb5   : > { %p2145_p13 = pneg %p2144_p4 }
  0xb7   : > { %p2152_p0 = pnand %p2151_p12, %p2145_p13 }
  0xb9   : > { %2155 = shalt.err (!%p2152_p0)
}
  0xba   : > { %p3351_p1 = scmp.ne.s32.totalorder %s3334_s18, 0  ;;  %s2489_s23 = smov [#allocation14]  }
  0xbb   : > { %s431_s30 = sshll.u32 %s2489_s23, 4  ;;  %s2156_s17 = scalar_lea.hbm %s3285_s4, 256  ;;  %s432_s30 = int_to_ptr.vmem [resolvable:$true] %s431_s30 }
  0xbc   : > { %1819 = dma.hbm_to_vmem [thread:$0]  (!%p3351_p1), %s3349_s2, 16, %s409_s19, [#allocation10]  }
  0xbd   : > { %p2157_p6 = scmp.ne.s32.totalorder %s3285_s4, %s2156_s17  ;;  %p2163_p10 = scmp.lt.u32.totalorder %s2156_s17, %s3285_s4 }
  0xbf   : > { %p2159_p0 = pnand %p2157_p6, %p3350_p3 }
  0xc1   : > { %p2160_p8 = pneg %p2159_p0 }
  0xc3   : > { %p2165_p11 = pnand %p2163_p10, %p2160_p8 }
  0xc5   : > { %2168 = shalt.err (!%p2165_p11)
}
  0xc6   : > { %s2169_s19 = scalar_lea.vmem %s432_s30, 256  ;;  %p2177_p5 = scmp.lt.s32.totalorder %s432_s30, %s432_s30 }
  0xc7   : > { %p2170_p7 = scmp.ne.s32.totalorder %s432_s30, %s2169_s19  ;;  %p2178_p9 = scmp.lt.s32.totalorder %s2169_s19, %s2169_s19 }
  0xc9   : > { %p2172_p4 = pnand %p2170_p7, %p3350_p3  ;;  %p2179_p12 = por %p2178_p9, %p2177_p5 }
  0xcb   : > { %p2173_p13 = pneg %p2172_p4 }
  0xcd   : > { %p2180_p2 = pnand %p2179_p12, %p2173_p13 }
  0xcf   : > { %2183 = shalt.err (!%p2180_p2)
}
  0xd0   : > { %s2490_s11 = smov 64   ;;  %s2491_s7 = smov 4  }
  0xd1   : > { %1825 = dma.hbm_to_vmem [thread:$0]  (!%p3351_p1), %s3285_s4, 256, %s432_s30, [#allocation13], %s2490_s11, %s2490_s11, %s2491_s7  }
  0xd2   : > { %s2492_s5 = smov [#allocation17]   ;;  %s1708_s17 = sshll.u32 %s2726_s22, 3 }
  0xd3   : > { %s456_s24 = sshll.u32 %s2492_s5, 4  ;;  %s2184_s3 = scalar_lea.hbm %s3287_s6, 16  ;;  %s457_s24 = int_to_ptr.vmem [resolvable:$true] %s456_s24 }
  0xd4   : > { %p2185_p2 = scmp.ne.s32.totalorder %s3287_s6, %s2184_s3  ;;  %p2191_p8 = scmp.lt.u32.totalorder %s2184_s3, %s3287_s6 }
  0xd6   : > { %p2187_p6 = pnand %p2185_p2, %p3350_p3 }
  0xd8   : > { %p2188_p0 = pneg %p2187_p6 }
  0xda   : > { %p2193_p10 = pnand %p2191_p8, %p2188_p0 }
  0xdc   : > { %2196 = shalt.err (!%p2193_p10)
}
  0xdd   : > { %s2197_s30 = scalar_lea.vmem %s457_s24, 16  ;;  %s2204_s11 = scalar_lea.vmem %s457_s24, 32 }
  0xde   : > { %p2198_p11 = scmp.ne.s32.totalorder %s457_s24, %s2197_s30  ;;  %p2205_p13 = scmp.lt.s32.totalorder %s457_s24, %s457_s24 }
  0xdf   : > { %p2206_p5 = scmp.lt.s32.totalorder %s2204_s11, %s2197_s30 }
  0xe0   : > { %p2200_p7 = pnand %p2198_p11, %p3350_p3 }
  0xe1   : > { %p2207_p9 = por %p2206_p5, %p2205_p13 }
  0xe2   : > { %p2201_p4 = pneg %p2200_p7 }
  0xe4   : > { %p2208_p12 = pnand %p2207_p9, %p2201_p4 }
  0xe6   : > { %2211 = shalt.err (!%p2208_p12)
}
  0xe7   : > { %1831 = dma.hbm_to_vmem [thread:$0]  (!%p3351_p1), %s3287_s6, 16, %s457_s24, [#allocation16]  }
  0xe8   : > { %s1709_s14 = sshll.u32 %s2480_s28, 7  ;;  %s471_s21 = scalar_lea.vmem [#allocation6], %s1708_s17 }
  0xe9   : > { %s478_s16 = sshll.u32 %s471_s21, 4  ;;  %s2841_s5 = scalar_lea.hbm %s3281_s0, %s1709_s14  ;;  %s479_s16 = int_to_ptr.vmem [resolvable:$true] %s478_s16 }
  0xea   : > { %s468_s18 = scalar_lea.sflag [#allocation7], %s2726_s22  ;;  %s2212_s10 = scalar_lea.hbm %s2841_s5, 128 }
  0xeb   : > { %p2213_p3 = scmp.ne.s32.totalorder %s2841_s5, %s2212_s10  ;;  %p3352_p2 = scmp.ne.s32.totalorder %s3348_s13, 0 }
  0xec   : > { %s2217_s17 = scalar_lea.hbm %s3281_s0, 256  ;;  %p2218_p1 = scmp.lt.u32.totalorder %s2841_s5, %s3281_s0 }
  0xed   : > { %p2215_p6 = pnand %p2213_p3, %p3352_p2  ;;  %p2219_p8 = scmp.lt.u32.totalorder %s2217_s17, %s2212_s10 }
  0xee   : > { %p2221_p11 = scmp.lt.u32.totalorder %s2212_s10, %s2841_s5 }
  0xef   : > { %p2216_p0 = pneg %p2215_p6  ;;  %p2220_p10 = por %p2219_p8, %p2218_p1 }
  0xf1   : > { %p2222_p7 = por %p2221_p11, %p2220_p10 }
  0xf3   : > { %p2223_p4 = pnand %p2222_p7, %p2216_p0 }
  0xf5   : > { %2226 = shalt.err (!%p2223_p4)
}
  0xf6   : > { %s2227_s30 = scalar_lea.vmem %s479_s16, 128  ;;  %s2493_s11 = smov [#allocation6]  }
  0xf7   : > { %p2228_p13 = scmp.ne.s32.totalorder %s479_s16, %s2227_s30  ;;  %s2232_s2 = sshll.u32 %s2493_s11, 4  ;;  %s2233_s2 = int_to_ptr.vmem [resolvable:$false] %s2232_s2 }
  0xf8   : > { %s2234_s7 = scalar_lea.vmem %s2233_s2, 256  ;;  %p2235_p12 = scmp.lt.s32.totalorder %s479_s16, %s2233_s2 }
  0xf9   : > { %p2230_p5 = pnand %p2228_p13, %p3352_p2  ;;  %p2236_p3 = scmp.lt.s32.totalorder %s2234_s7, %s2227_s30 }
  0xfb   : > { %p2231_p9 = pneg %p2230_p5  ;;  %p2237_p6 = por %p2236_p3, %p2235_p12 }
  0xfd   : > { %p2238_p1 = pnand %p2237_p6, %p2231_p9 }
  0xff   : > { %2241 = shalt.err (!%p2238_p1)
}
 0x100   : > { %p3353_p8 = scmp.ne.s32.totalorder %s3346_s12, 0  ;;  %s2865_s29 = scalar_lea.hbm %s3289_s8, %s2738_s1 }
 0x101   : > { %s505_s23 = scalar_lea.vmem [#allocation20], %s2726_s22  ;;  %s2242_s24 = scalar_lea.hbm %s2865_s29, 16 }
 0x102   : > { %1835 = dma.hbm_to_vmem [thread:$0]  (!%p3353_p8), %s2841_s5, 128, %s479_s16, %s468_s18  }
 0x103   : > { %s512_s10 = sshll.u32 %s505_s23, 4  ;;  %p2243_p0 = scmp.ne.s32.totalorder %s2865_s29, %s2242_s24  ;;  %s513_s10 = int_to_ptr.vmem [resolvable:$true] %s512_s10 }
 0x104   : > { %s2247_s16 = scalar_lea.hbm %s3289_s8, 32  ;;  %p2248_p7 = scmp.lt.u32.totalorder %s2865_s29, %s3289_s8 }
 0x105   : > { %p2245_p10 = pnand %p2243_p0, %p3352_p2  ;;  %p2249_p4 = scmp.lt.u32.totalorder %s2247_s16, %s2242_s24 }
 0x106   : > { %p2251_p5 = scmp.lt.u32.totalorder %s2242_s24, %s2865_s29 }
 0x107   : > { %p2246_p11 = pneg %p2245_p10  ;;  %p2250_p13 = por %p2249_p4, %p2248_p7 }
 0x109   : > { %p2252_p9 = por %p2251_p5, %p2250_p13 }
 0x10b   : > { %p2253_p12 = pnand %p2252_p9, %p2246_p11 }
 0x10d   : > { %2256 = shalt.err (!%p2253_p12)
}
 0x10e   : > { %s2257_s3 = scalar_lea.vmem %s513_s10, 16  ;;  %s2494_s19 = smov [#allocation20]  }
 0x10f   : > { %p2258_p3 = scmp.ne.s32.totalorder %s513_s10, %s2257_s3  ;;  %s2262_s30 = sshll.u32 %s2494_s19, 4  ;;  %s2263_s30 = int_to_ptr.vmem [resolvable:$false] %s2262_s30 }
 0x110   : > { %s2264_s11 = scalar_lea.vmem %s2263_s30, 32  ;;  %p2265_p0 = scmp.lt.s32.totalorder %s513_s10, %s2263_s30 }
 0x111   : > { %p2260_p6 = pnand %p2258_p3, %p3352_p2  ;;  %p2266_p10 = scmp.lt.s32.totalorder %s2264_s11, %s2257_s3 }
 0x113   : > { %p2261_p1 = pneg %p2260_p6  ;;  %p2267_p8 = por %p2266_p10, %p2265_p0 }
 0x115   : > { %p2268_p4 = pnand %p2267_p8, %p2261_p1 }
 0x117   : > { %2271 = shalt.err (!%p2268_p4)
}
 0x118   : > { %p3354_p7 = scmp.ne.s32.totalorder %s3346_s12, 0  ;;  %s2890_s14 = scalar_lea.hbm %s3290_s9, %s2738_s1 }
 0x119   : > { %s522_s21 = scalar_lea.vmem [#allocation21], %s2726_s22  ;;  %s520_s24 = scalar_lea.sflag [#allocation22], %s2726_s22 }
 0x11a   : > { %1841 = dma.hbm_to_vmem [thread:$0]  (!%p3354_p7), %s2865_s29, 16, %s513_s10, %s2751_s27  }
 0x11b   : > { %s529_s23 = sshll.u32 %s522_s21, 4  ;;  %s2272_s25 = scalar_lea.hbm %s2890_s14, 16  ;;  %s530_s23 = int_to_ptr.vmem [resolvable:$true] %s529_s23 }
 0x11c   : > { %p2273_p8 = scmp.ne.s32.totalorder %s2890_s14, %s2272_s25  ;;  %s2277_s29 = scalar_lea.hbm %s3290_s9, 32 }
 0x11d   : > { %p2278_p5 = scmp.lt.u32.totalorder %s2890_s14, %s3290_s9  ;;  %p2279_p9 = scmp.lt.u32.totalorder %s2277_s29, %s2272_s25 }
 0x11e   : > { %p2275_p11 = pnand %p2273_p8, %p3352_p2  ;;  %p2281_p3 = scmp.lt.u32.totalorder %s2272_s25, %s2890_s14 }
 0x11f   : > { %p2280_p12 = por %p2279_p9, %p2278_p5 }
 0x120   : > { %p2276_p13 = pneg %p2275_p11 }
 0x121   : > { %p2282_p6 = por %p2281_p3, %p2280_p12 }
 0x123   : > { %p2283_p1 = pnand %p2282_p6, %p2276_p13 }
 0x125   : > { %2286 = shalt.err (!%p2283_p1)
}
 0x126   : > { %s2287_s22 = scalar_lea.vmem %s530_s23, 16  ;;  %s2495_s16 = smov [#allocation21]  }
 0x127   : > { %p2288_p0 = scmp.ne.s32.totalorder %s530_s23, %s2287_s22  ;;  %s2292_s5 = sshll.u32 %s2495_s16, 4  ;;  %s2293_s5 = int_to_ptr.vmem [resolvable:$false] %s2292_s5 }
 0x128   : > { %s2294_s18 = scalar_lea.vmem %s2293_s5, 32  ;;  %p2295_p8 = scmp.lt.s32.totalorder %s530_s23, %s2293_s5 }
 0x129   : > { %p2290_p10 = pnand %p2288_p0, %p3352_p2  ;;  %p2296_p11 = scmp.lt.s32.totalorder %s2294_s18, %s2287_s22 }
 0x12b   : > { %p2291_p4 = pneg %p2290_p10  ;;  %p2297_p7 = por %p2296_p11, %p2295_p8 }
 0x12d   : > { %p2298_p5 = pnand %p2297_p7, %p2291_p4 }
 0x12f   : > { %2301 = shalt.err (!%p2298_p5)
}
 0x130   : > { %p3355_p9 = scmp.ne.s32.totalorder %s3346_s12, 0  ;;  %p3356_p13 = scmp.ne.s32.totalorder %s3333_s15, 0 }
 0x131   : > { %s2914_s13 = sand.u32 (!%p3356_p13), 1, %s2472_s26   ;;  %p3357_p2 = scmp.ne.s32.totalorder (!%p3356_p13), %s3341_s20, 0 }
 0x132   : > { %1844 = dma.hbm_to_vmem [thread:$0]  (!%p3355_p9), %s2890_s14, 16, %s530_s23, %s520_s24  }
 0x133   : > { %538 = sbr.rel (%p3356_p13) target bundleno = 1196 (0x4ac), region = 60  ;;  %s1714_s3 = sshll.u32 (!%p3356_p13), %s2914_s13, 3 }
 0x134   : > { %s541_s19 = scalar_lea.sflag (!%p3356_p13), [#allocation7], %s2914_s13  ;;  %s544_s30 = scalar_lea.vmem (!%p3356_p13), [#allocation6], %s1714_s3 }
 0x13a   : > { %2431 = dma.done.wait (%p3357_p2), %s541_s19, 128  }
 0x13b   : > { %2433 = vsyncadd (%p3357_p2), %s541_s19, 4294967168  ;;  %s3358_s12 = sld [smem:[#allocation40_spill]] }
 0x141   : > { %p3359_p7 = scmp.eq.s32.totalorder %s3358_s12, 0 }
 0x143   : > { %2435 = dma.done.wait (%p3359_p7), [#allocation10], 32   ;;  %p3360_p12 = pmov %p3359_p7 }
 0x144   : > { %p3361_p3 = pmov %p3359_p7 }
 0x145   : > { %2437 = vsyncadd (%p3360_p12), [#allocation10], 4294967264 }
 0x146   : > { %2439 = dma.done.wait (%p3361_p3), [#allocation13], 1024   ;;  %p3362_p6 = pmov %p3361_p3 }
 0x147   : > { %p3363_p1 = pmov %p3361_p3 }
 0x148   : > { %2441 = vsyncadd (%p3362_p6), [#allocation13], 4294966272 }
 0x149   : > { %2443 = dma.done.wait (%p3363_p1), [#allocation16], 32   ;;  %p3364_p0 = pmov %p3363_p1 }
 0x14a   : > { %s573_s15 = sand.u32 1, %s3358_s12   ;;  %s576_s2 = scalar_lea.vmem [#allocation18], %s2914_s13 }
 0x14b   : > { %2445 = vsyncadd (%p3364_p0), [#allocation16], 4294967264  ;;  %s574_s11 = scalar_lea.sflag [#allocation19], %s573_s15 }
 0x14c   : > { %2447 = dma.done.wait (%p3357_p2), %s574_s11, 32  }
 0x14d   : > { %2449 = vsyncadd (%p3357_p2), %s574_s11, 4294967264  ;;  %s584_s7 = scalar_lea.vmem [#allocation20], %s2914_s13  ;;  %s590_s14 = scalar_lea.sflag [#allocation22], %s2914_s13 }
 0x14e   : > { %s592_s21 = scalar_lea.vmem [#allocation21], %s2914_s13 }
 0x14f   : > { %2451 = dma.done.wait (%p3357_p2), %s590_s14, 16  }
 0x150   : > { %2453 = vsyncadd (%p3357_p2), %s590_s14, 4294967280  ;;  %vm663_vm0 = vcmask 261120   ;;  %v2949_v0 = vld [vmem:[%s544_s30] sm:$0xff]  ;;  %v2496_v10 = vmov 0.0   ;;  %v1922_v11 = vld [vmem:[#allocation12 + $0x1c] ss:$12 sps:$4 sm:$0xff]   ;;  %v826_v29 = vlaneseq }
 0x151   : > { %v664_v1 = vsel %vm663_vm0, %v2949_v0, 0.0  ;;  %v1918_v7 = vld [vmem:[#allocation12 + $0x4] ss:$12 sps:$4 sm:$0xff]   ;;  %v1920_v8 = vld [vmem:[#allocation12] ss:$12 sps:$4 sm:$0xff]   ;;  %1757 = vmatprep.subr.bf16.mxu1 %v2496_v10  ;;  %v2497_v14 = vmov 0  }
 0x152   : > { %665 = vadd.xlane.f32.xlu0 %v664_v1  ;;  %v1921_v9 = vld [vmem:[#allocation12 + $0x8] ss:$12 sps:$4 sm:$0xff]   ;;  %736 = vmatprep.subr.bf16.mxu0 %v1918_v7  ;;  %v1924_v12 = vld [vmem:[#allocation12 + $0x18] ss:$12 sps:$4 sm:$0xff]   ;;  %v1925_v13 = vld [vmem:[#allocation12 + $0x20] ss:$12 sps:$4 sm:$0xff]  }
 0x153   : > { %737 = vmatpush1.bf16.msra.mxu0 %v1920_v8  ;;  %1758 = vmatpush3.bf16.msra.mxu1 %v1921_v9  ;;  %vm2498_vm1 = vmmov 0   ;;  %v1722_v19 = vld [vmem:[#allocation9] ss:$0 sm:$0xff]  ;;  %v1723_v21 = vld [vmem:[#allocation11] ss:$0 sm:$0xff]  ;;  %v1926_v25 = vld [vmem:[#allocation14] sm:$0xff]  }
 0x154   : > { %738 = vmatprep.subr.bf16.mxu0 %v1922_v11  ;;  %1759 = vmatprep.subr.bf16.mxu1 %v2496_v10  ;;  %v1927_v26 = vld [vmem:[#allocation14 + $0x8] sm:$0xff]   ;;  %v2499_v27 = vmov 1966171168   ;;  %v827_v31 = vshrl.u32 %v826_v29, 7  ;;  %v2967_v48 = vld [vmem:[#allocation15] sm:$0x1] }
 0x155   : > { %768 = vmatprep.mubr.bf16.mxu0 %v2497_v14  ;;  %1761 = vmatprep.mubr.msk.bf16.mxu1 %vm2498_vm1, %v2496_v10  ;;  %v824_v28 = vunpack.c.l.s4 %v2499_v27  ;;  %v958_v49 = vld [vmem:[%s592_s21] sm:$0x1]  ;;  %s658_s20 = scalar_lea.vmem [#allocation27], %s2914_s13  ;;  %s652_s23 = scalar_lea.vmem [#allocation26], %s2914_s13 }
 0x156   : > { %v977_v1 = vsub.f32 %v958_v49, %v2967_v48  ;;  %s646_s24 = scalar_lea.vmem [#allocation24], %s2914_s13  ;;  %s3365_s25 = sld [smem:[#allocation43_spill]] }
 0x157   : > { %739 = vmatpush1.bf16.msra.mxu0 %v1924_v12  ;;  %1760 = vmatpush3.bf16.msra.mxu1 %v1925_v13  ;;  %v825_v30 = vunpack.c.0.s8 %v824_v28  ;;  %s3145_s17 = sshll.u32 %s3358_s12, 4  ;;  %s3366_s10 = sld [smem:[#allocation51_spill]] }
 0x158   : > { %1765 = vmatprep.subr.bf16.mxu0 %v2496_v10  ;;  %s1408_s22 = sshll.u32 %s646_s24, 4  ;;  %s3157_s16 = scalar_lea.sflag [#allocation25], %s573_s15  ;;  %s1409_s22 = int_to_ptr.vmem [resolvable:$true] %s1408_s22 }
 0x159   : > { %v2959_v32 = vsub.s32 %v825_v30, %v827_v31  ;;  %s2302_s5 = scalar_lea.vmem %s1409_s22, 16  ;;  %s2500_s18 = smov [#allocation24]  }
 0x15a   : > { %p2303_p10 = scmp.ne.s32.totalorder %s1409_s22, %s2302_s5  ;;  %s2306_s3 = sshll.u32 %s2500_s18, 4  ;;  %s2307_s3 = int_to_ptr.vmem [resolvable:$false] %s2306_s3 }
 0x15b   : > { %s2308_s19 = scalar_lea.vmem %s2307_s3, 32  ;;  %p2309_p5 = scmp.lt.s32.totalorder %s1409_s22, %s2307_s3 }
 0x15c   : > { %p3367_p4 = scmp.ne.s32.totalorder %s3365_s25, 0  ;;  %p2310_p9 = scmp.lt.s32.totalorder %s2308_s19, %s2302_s5 }
 0x15d   : > { %s3151_s1 = scalar_lea.hbm %s3366_s10, %s3145_s17 }
 0x15e   : > { %p2304_p8 = pnand %p2303_p10, %p3367_p4  ;;  %p2311_p13 = por %p2310_p9, %p2309_p5 }
 0x160   : > { %p2305_p11 = pneg %p2304_p8 }
 0x162   : > { %p2312_p2 = pnand %p2311_p13, %p2305_p11 }
 0x1df   : > { %v666_v2 = vpop.xlane.xlu0 %665 }
 0x1e0   : > { %v668_v3 = vmul.f32 0.03125, %v666_v2  ;;  %v2979_v2 = vld [vmem:[#allocation17] sm:$0x1] }
 0x1e2   : > { %v669_v4 = vsub.f32 %v2949_v0, %v668_v3 }
 0x1e4   : > { %v670_v5 = vmul.f32 %v669_v4, %v669_v4 }
 0x1e6   : > { %v671_v6 = vsel %vm663_vm0, %v670_v5, 0.0 }
 0x1e7   : > { %672 = vadd.xlane.f32.xlu0 %v671_v6 }
 0x274   : > { %v673_v15 = vpop.xlane.xlu0 %672 }
 0x275   : > { %v674_v16 = vmul.f32 0.03125, %v673_v15 }
 0x277   : > { %v675_v17 = vadd.f32 1e-05, %v674_v16 }
 0x279   : > { %1928 = vrsqrt.f32 %v675_v17 }
 0x283   : > { %v1929_v18 = vpop.eup %1928 }
 0x284   : > { %v677_v20 = vmul.f32 %v1929_v18, %v669_v4 }
 0x286   : > { %v684_v22 = vmul.f32 %v1722_v19, %v677_v20 }
 0x288   : > { %v691_v23 = vadd.f32 %v1723_v21, %v684_v22 }
 0x28a   : > { %v692_v24 = vpack.c.bf16 %v691_v23, %v691_v23 }
 0x28c   : > { %1730 = vmatmul.mubr.msk.bf16.vlgmr.msra.gmra.mrb[0].mxu0 %vm663_vm0, %v692_v24  ;;  %1762 = vmatmul.mubr.msk.bf16.vlgmr.msra.gmra.mrb[0].mxu1 %vm663_vm0, %v692_v24 }
 0x28d   : > { %1769 = vmatprep.mubr.msk.bf16.mxu0 %vm2498_vm1, %v2496_v10  ;;  %1766 = vmatpush3.bf16.msra.mxu0 %v1926_v25 }
 0x28e   : > { %1767 = vmatprep.subr.bf16.mxu0 %v2496_v10 }
 0x291   : > { %1768 = vmatpush3.bf16.msra.mxu0 %v1927_v26 }
 0x35f   : > { %v770_v33 = vpop.f32.mrb[0].mxu0  ;;  %v2961_v34 = vpop.f32.mrb[0].mxu1 }
 0x360   : > { %v822_v35 = vcombine.high %v770_v33, %v770_v33  ;;  %v829_v36 = vrot.slane %v770_v33, %v2959_v32  ;;  %v772_v37 = vpop.f32.mrb[1].mxu0  ;;  %v1763_v38 = vpop.f32.mrb[1].mxu1 }
 0x361   : > { %v889_v39 = vcombine.high %v772_v37, %v772_v37  ;;  %v896_v40 = vrot.slane %v772_v37, %v2959_v32  ;;  %v774_v41 = vpop.f32.mrb[2].mxu0  ;;  %v814_v42 = vpop.f32.mrb[2].mxu1 }
 0x362   : > { %v836_v43 = vrot.slane %v822_v35, %v2959_v32  ;;  %v837_v44 = vcombine.high %v829_v36, %v829_v36  ;;  %v845_v45 = vrot.slane %v829_v36, %v2959_v32  ;;  %1732 = vst.sshfl [vmem:[#allocation3] sm:$0x1 pattern:$0x73625140] %v829_v36  ;;  %v775_v46 = vpop.f32.mrb[3].mxu0  ;;  %v1764_v47 = vpop.f32.mrb[3].mxu1 }
 0x363   : > { %v903_v50 = vrot.slane %v889_v39, %v2959_v32  ;;  %v904_v51 = vcombine.high %v896_v40, %v896_v40  ;;  %v912_v52 = vrot.slane %v896_v40, %v2959_v32  ;;  %1736 = vst.sshfl [vmem:[#allocation4] sm:$0x1 pattern:$0x73625140] %v896_v40 }
 0x364   : > { %v838_v53 = vcombine.high %v836_v43, %v836_v43  ;;  %v852_v54 = vrot.slane %v836_v43, %v2959_v32  ;;  %v859_v55 = vrot.slane %v837_v44, %v2959_v32  ;;  %v867_v56 = vcombine.high %v845_v45, %v845_v45  ;;  %1733 = vst.sshfl [vmem:[#allocation3 + $0x1] sm:$0x1 pattern:$0x73625140] %v837_v44 }
 0x365   : > { %1734 = vst.sshfl [vmem:[#allocation3 + $0x4] sm:$0x1 pattern:$0x73625140] %v836_v43  ;;  %v905_v57 = vcombine.high %v903_v50, %v903_v50  ;;  %v919_v58 = vrot.slane %v903_v50, %v2959_v32  ;;  %v926_v59 = vrot.slane %v904_v51, %v2959_v32  ;;  %v934_v60 = vcombine.high %v912_v52, %v912_v52 }
 0x366   : > { %1737 = vst.sshfl [vmem:[#allocation4 + $0x1] sm:$0x1 pattern:$0x73625140] %v904_v51  ;;  %v866_v61 = vrot.slane %v838_v53, %v2959_v32  ;;  %v868_v62 = vcombine.high %v852_v54, %v852_v54  ;;  %v869_v63 = vcombine.high %v859_v55, %v859_v55  ;;  %881 = vst [vmem:[#allocation3 + $0x2] sm:$0x1] %v867_v56 }
 0x367   : > { %1738 = vst.sshfl [vmem:[#allocation4 + $0x4] sm:$0x1 pattern:$0x73625140] %v903_v50  ;;  %v933_v3 = vrot.slane %v905_v57, %v2959_v32  ;;  %v935_v4 = vcombine.high %v919_v58, %v919_v58  ;;  %v936_v5 = vcombine.high %v926_v59, %v926_v59  ;;  %948 = vst [vmem:[#allocation4 + $0x2] sm:$0x1] %v934_v60 }
 0x368   : > { %1735 = vst.sshfl [vmem:[#allocation3 + $0x5] sm:$0x1 pattern:$0x73625140] %v838_v53  ;;  %v870_v6 = vcombine.high %v866_v61, %v866_v61  ;;  %882 = vst [vmem:[#allocation3 + $0x3] sm:$0x1] %v869_v63 }
 0x369   : > { %1739 = vst.sshfl [vmem:[#allocation4 + $0x5] sm:$0x1 pattern:$0x73625140] %v905_v57  ;;  %885 = vst [vmem:[#allocation3 + $0x6] sm:$0x1] %v868_v62  ;;  %v937_v8 = vcombine.high %v933_v3, %v933_v3 }
 0x36a   : > { %v959_v7 = vld [vmem:[#allocation3] sm:$0x1]  ;;  %949 = vst [vmem:[#allocation4 + $0x3] sm:$0x1] %v936_v5  ;;  %952 = vst [vmem:[#allocation4 + $0x6] sm:$0x1] %v935_v4 }
 0x36b   : > { %886 = vst [vmem:[#allocation3 + $0x7] sm:$0x1] %v870_v6  ;;  %v961_v9 = vadd.f32 %v959_v7, %v2979_v2  ;;  %v978_v10 = vmax.f32 %v977_v1, %v959_v7  ;;  %v991_v11 = vld [vmem:[#allocation3 + $0x1] sm:$0x1]  ;;  %953 = vst [vmem:[#allocation4 + $0x7] sm:$0x1] %v937_v8 }
 0x36c   : > { %v994_v15 = vadd.f32 %v991_v11, %v2979_v2  ;;  %v1093_v50 = vld [vmem:[#allocation3 + $0x4] sm:$0x1]  ;;  %v2991_v51 = vld [vmem:[%s584_s7] sm:$0x1] }
 0x36d   : > { %v962_v12 = vmax.f32 %v958_v49, %v961_v9  ;;  %v979_v13 = vsub.f32 %v977_v1, %v978_v10  ;;  %v982_v14 = vsub.f32 %v959_v7, %v978_v10  ;;  %v1011_v16 = vsub.f32 %v978_v10, %v2967_v48  ;;  %v1025_v17 = vld [vmem:[#allocation3 + $0x2] sm:$0x1] }
 0x36e   : > { %v995_v22 = vmax.f32 %v978_v10, %v994_v15  ;;  %v1028_v24 = vadd.f32 %v1025_v17, %v2979_v2  ;;  %v1096_v59 = vadd.f32 %v1093_v50, %v2979_v2 }
 0x36f   : > { %v963_v18 = vsub.f32 %v958_v49, %v962_v12  ;;  %v966_v19 = vsub.f32 %v961_v9, %v962_v12  ;;  %v980_v20 = vmul.f32 1.442695, %v979_v13  ;;  %v983_v21 = vmul.f32 1.442695, %v982_v14  ;;  %v1059_v35 = vld [vmem:[#allocation3 + $0x3] sm:$0x1] }
 0x370   : > { %v1012_v23 = vmax.f32 %v1011_v16, %v991_v11  ;;  %v996_v27 = vsub.f32 %v978_v10, %v995_v22  ;;  %v999_v28 = vsub.f32 %v994_v15, %v995_v22  ;;  %v1062_v43 = vadd.f32 %v1059_v35, %v2979_v2  ;;  %v1127_v7 = vld [vmem:[#allocation3 + $0x5] sm:$0x1] }
 0x371   : > { %v964_v25 = vmul.f32 1.442695, %v963_v18  ;;  %1930 = vpow2.f32 %v980_v20  ;;  %v967_v26 = vmul.f32 1.442695, %v966_v19 }
 0x372   : > { %v1013_v29 = vsub.f32 %v1011_v16, %v1012_v23  ;;  %1932 = vpow2.f32 %v983_v21  ;;  %v1016_v30 = vsub.f32 %v991_v11, %v1012_v23  ;;  %v1029_v31 = vmax.f32 %v1012_v23, %v1028_v24 }
 0x373   : > { %v1045_v33 = vsub.f32 %v1012_v23, %v2967_v48  ;;  %1934 = vpow2.f32 %v964_v25  ;;  %v997_v36 = vmul.f32 1.442695, %v996_v27  ;;  %v1000_v38 = vmul.f32 1.442695, %v999_v28  ;;  %v3014_v25 = vld [vmem:[#allocation3 + $0x6] sm:$0x1] }
 0x374   : > { %v1014_v37 = vmul.f32 1.442695, %v1013_v29  ;;  %v1030_v39 = vsub.f32 %v1012_v23, %v1029_v31  ;;  %v1033_v40 = vsub.f32 %v1028_v24, %v1029_v31  ;;  %1936 = vpow2.f32 %v967_v26 }
 0x375   : > { %v1046_v41 = vmax.f32 %v1045_v33, %v1025_v17  ;;  %v1017_v42 = vmul.f32 1.442695, %v1016_v30  ;;  %1938 = vpow2.f32 %v997_v36 }
 0x376   : > { %v1031_v44 = vmul.f32 1.442695, %v1030_v39  ;;  %1940 = vpow2.f32 %v1014_v37  ;;  %v1034_v52 = vmul.f32 1.442695, %v1033_v40  ;;  %v3028_v39 = vld [vmem:[%s576_s2] sm:$0x1] }
 0x377   : > { %v1047_v45 = vsub.f32 %v1045_v33, %v1046_v41  ;;  %v1050_v46 = vsub.f32 %v1025_v17, %v1046_v41  ;;  %v1063_v47 = vmax.f32 %v1046_v41, %v1062_v43  ;;  %v1079_v49 = vsub.f32 %v1046_v41, %v2967_v48 }
 0x378   : > { %1942 = vpow2.f32 %v1000_v38  ;;  %v1130_v17 = vadd.f32 %v1127_v7, %v2979_v2  ;;  %v1164_v38 = vadd.f32 %v3014_v25, %v2979_v2 }
 0x379   : > { %v1048_v53 = vmul.f32 1.442695, %v1047_v45  ;;  %1944 = vpow2.f32 %v1017_v42  ;;  %v1051_v54 = vmul.f32 1.442695, %v1050_v46  ;;  %v1064_v55 = vsub.f32 %v1046_v41, %v1063_v47 }
 0x37a   : > { %v1067_v56 = vsub.f32 %v1062_v43, %v1063_v47  ;;  %1946 = vpow2.f32 %v1031_v44  ;;  %v1080_v58 = vmax.f32 %v1079_v49, %v1059_v35 }
 0x37b   : > { %v2993_v57 = vpop.eup %1930  ;;  %1948 = vpow2.f32 %v1048_v53  ;;  %v1065_v61 = vmul.f32 1.442695, %v1064_v55 }
 0x37c   : > { %v988_v60 = vmul.f32 %v2993_v57, %v2991_v51  ;;  %v1933_v62 = vpop.eup %1932  ;;  %1950 = vpow2.f32 %v1034_v52  ;;  %v1081_v63 = vsub.f32 %v1079_v49, %v1080_v58  ;;  %v1084_v1 = vsub.f32 %v1059_v35, %v1080_v58  ;;  %v3039_v52 = vld [vmem:[#allocation4] sm:$0x1] }
 0x37d   : > { %v1097_v3 = vmax.f32 %v1080_v58, %v1096_v59  ;;  %v2998_v4 = vpop.eup %1934  ;;  %1952 = vpow2.f32 %v1051_v54  ;;  %v1068_v5 = vmul.f32 1.442695, %v1067_v56  ;;  %v1113_v6 = vsub.f32 %v1080_v58, %v2967_v48 }
 0x37e   : > { %v3001_v8 = vadd.f32 %v1933_v62, %v988_v60  ;;  %v1082_v9 = vmul.f32 1.442695, %v1081_v63  ;;  %v1085_v10 = vmul.f32 1.442695, %v1084_v1  ;;  %v3003_v12 = vpop.eup %1936  ;;  %1954 = vpow2.f32 %v1065_v61 }
 0x37f   : > { %v1098_v11 = vsub.f32 %v1080_v58, %v1097_v3  ;;  %v1101_v13 = vsub.f32 %v1096_v59, %v1097_v3  ;;  %v1114_v14 = vmax.f32 %v1113_v6, %v1093_v50  ;;  %v3005_v15 = vpop.eup %1938  ;;  %v972_v41 = vmul.f32 %v2998_v4, %v2991_v51 }
 0x380   : > { %1956 = vpow2.f32 %v1082_v9  ;;  %v3008_v18 = vpop.eup %1940  ;;  %v985_v51 = vmul.f32 %v2993_v57, %v3028_v39  ;;  %v986_v55 = vmul.f32 %v1933_v62, %v3039_v52  ;;  %v1005_v9 = vmul.f32 %v3005_v15, %v3001_v8 }
 0x381   : > { %v1099_v16 = vmul.f32 1.442695, %v1098_v11  ;;  %1958 = vpow2.f32 %v1068_v5  ;;  %v1102_v19 = vmul.f32 1.442695, %v1101_v13  ;;  %v1115_v20 = vsub.f32 %v1113_v6, %v1114_v14 }
 0x382   : > { %v1118_v21 = vsub.f32 %v1093_v50, %v1114_v14  ;;  %v3010_v22 = vpop.eup %1942  ;;  %v1022_v23 = vmul.f32 %v3008_v18, %v3001_v8  ;;  %1960 = vpow2.f32 %v1085_v10  ;;  %v1131_v24 = vmax.f32 %v1114_v14, %v1130_v17  ;;  %v3037_v50 = vld [vmem:[#allocation3 + $0x7] sm:$0x1] }
 0x383   : > { %v3016_v26 = vpop.eup %1944  ;;  %1962 = vpow2.f32 %v1099_v16  ;;  %v1116_v27 = vmul.f32 1.442695, %v1115_v20  ;;  %v1147_v29 = vsub.f32 %v1114_v14, %v2967_v48  ;;  %v1198_v3 = vadd.f32 %v3037_v50, %v2979_v2 }
 0x384   : > { %v1119_v28 = vmul.f32 1.442695, %v1118_v21  ;;  %v3019_v30 = vpop.eup %1946  ;;  %v1023_v31 = vadd.f32 %v3016_v26, %v1022_v23  ;;  %1964 = vpow2.f32 %v1102_v19  ;;  %v1132_v33 = vsub.f32 %v1114_v14, %v1131_v24 }
 0x385   : > { %v1135_v35 = vsub.f32 %v1130_v17, %v1131_v24  ;;  %v3022_v36 = vpop.eup %1948  ;;  %1966 = vpow2.f32 %v1116_v27  ;;  %v1148_v37 = vmax.f32 %v1147_v29, %v1127_v7  ;;  %v973_v57 = vadd.f32 %v3003_v12, %v972_v41  ;;  %v993_v41 = vld [vmem:[#allocation4 + $0x1] sm:$0x1] }
 0x386   : > { %v3030_v40 = vpop.eup %1950  ;;  %v1056_v42 = vmul.f32 %v3022_v36, %v1023_v31  ;;  %1968 = vpow2.f32 %v1119_v28  ;;  %v1133_v43 = vmul.f32 1.442695, %v1132_v33  ;;  %v987_v13 = vadd.f32 %v986_v55, %v985_v51  ;;  %v1027_v55 = vld [vmem:[#allocation4 + $0x2] sm:$0x1] }
 0x387   : > { %v3035_v44 = vpop.eup %1952  ;;  %v1136_v45 = vmul.f32 1.442695, %v1135_v35  ;;  %v1149_v46 = vsub.f32 %v1147_v29, %v1148_v37  ;;  %v1152_v47 = vsub.f32 %v1127_v7, %v1148_v37  ;;  %v1165_v49 = vmax.f32 %v1148_v37, %v1164_v38 }
 0x388   : > { %v1057_v53 = vadd.f32 %v3035_v44, %v1056_v42  ;;  %v1181_v54 = vsub.f32 %v1148_v37, %v2967_v48  ;;  %v3046_v56 = vpop.eup %1954  ;;  %1970 = vpow2.f32 %v1133_v43  ;;  %v1039_v20 = vmul.f32 %v3019_v30, %v1023_v31 }
 0x389   : > { %v1150_v58 = vmul.f32 1.442695, %v1149_v46  ;;  %v1153_v59 = vmul.f32 1.442695, %v1152_v47  ;;  %v1166_v60 = vsub.f32 %v1148_v37, %v1165_v49  ;;  %1972 = vpow2.f32 %v1136_v45 }
 0x38a   : > { %v3048_v61 = vpop.eup %1956  ;;  %v1169_v63 = vsub.f32 %v1164_v38, %v1165_v49  ;;  %v1182_v1 = vmax.f32 %v1181_v54, %v3014_v25  ;;  %v1073_v21 = vmul.f32 %v3046_v56, %v1057_v53  ;;  %v1019_v35 = vmul.f32 %v3008_v18, %v987_v13 }
 0x38b   : > { %v3053_v5 = vpop.eup %1958  ;;  %v1090_v62 = vmul.f32 %v3048_v61, %v1057_v53  ;;  %1974 = vpow2.f32 %v1150_v58  ;;  %v1167_v6 = vmul.f32 1.442695, %v1166_v60  ;;  %v1006_v31 = vadd.f32 %v3010_v22, %v1005_v9 }
 0x38c   : > { %v3057_v7 = vpop.eup %1960  ;;  %v1170_v10 = vmul.f32 1.442695, %v1169_v63  ;;  %v1183_v11 = vsub.f32 %v1181_v54, %v1182_v1  ;;  %1976 = vpow2.f32 %v1153_v59  ;;  %v1186_v16 = vsub.f32 %v3014_v25, %v1182_v1 }
 0x38d   : > { %v3061_v14 = vpop.eup %1962  ;;  %v1091_v2 = vadd.f32 %v3057_v7, %v1090_v62  ;;  %v1199_v17 = vmax.f32 %v1182_v1, %v1198_v3  ;;  %1978 = vpow2.f32 %v1167_v6  ;;  %v1040_v42 = vadd.f32 %v3030_v40, %v1039_v20 }
 0x38e   : > { %v3065_v19 = vpop.eup %1964  ;;  %v1184_v23 = vmul.f32 1.442695, %v1183_v11  ;;  %1980 = vpow2.f32 %v1170_v10  ;;  %v1187_v24 = vmul.f32 1.442695, %v1186_v16  ;;  %v1020_v45 = vmul.f32 %v3016_v26, %v993_v41 }
 0x38f   : > { %v3069_v8 = vpop.eup %1966  ;;  %v1200_v27 = vsub.f32 %v1182_v1, %v1199_v17  ;;  %v1203_v28 = vsub.f32 %v1198_v3, %v1199_v17  ;;  %v1107_v33 = vmul.f32 %v3061_v14, %v1091_v2  ;;  %v1074_v47 = vadd.f32 %v3053_v5, %v1073_v21 }
 0x390   : > { %v3071_v29 = vpop.eup %1968  ;;  %v1124_v25 = vmul.f32 %v3069_v8, %v1091_v2  ;;  %1982 = vpow2.f32 %v1184_v23  ;;  %v969_v18 = vmul.f32 %v2998_v4, %v3028_v39  ;;  %v1021_v51 = vadd.f32 %v1020_v45, %v1019_v35  ;;  %v1129_v45 = vld [vmem:[#allocation4 + $0x5] sm:$0x1] }
 0x391   : > { %1984 = vpow2.f32 %v1187_v24  ;;  %v1201_v37 = vmul.f32 1.442695, %v1200_v27  ;;  %v1204_v38 = vmul.f32 1.442695, %v1203_v28  ;;  %v1108_v53 = vadd.f32 %v3065_v19, %v1107_v33  ;;  %v1095_v27 = vld [vmem:[#allocation4 + $0x4] sm:$0x1] }
 0x392   : > { %v1125_v43 = vadd.f32 %v3071_v29, %v1124_v25  ;;  %1986 = vrcp.f32 %v973_v57  ;;  %v3080_v46 = vpop.eup %1970  ;;  %v970_v26 = vmul.f32 %v3003_v12, %v3039_v52  ;;  %v1054_v59 = vmul.f32 %v3035_v44, %v1027_v55  ;;  %v1061_v52 = vld [vmem:[#allocation4 + $0x3] sm:$0x1] }
 0x393   : > { %1988 = vpow2.f32 %v1201_v37  ;;  %v3085_v49 = vpop.eup %1972  ;;  %v1215_v60 = vsub.f32 %v1182_v1, %v2967_v48  ;;  %v1002_v63 = vmul.f32 %v3005_v15, %v987_v13  ;;  %v1003_v57 = vmul.f32 %v3010_v22, %v993_v41 }
 0x394   : > { %v1141_v54 = vmul.f32 %v3080_v46, %v1125_v43  ;;  %1990 = vpow2.f32 %v1204_v38  ;;  %v1053_v62 = vmul.f32 %v3022_v36, %v1021_v51  ;;  %v1088_v15 = vmul.f32 %v3057_v7, %v1061_v52 }
 0x395   : > { %v3089_v58 = vpop.eup %1974  ;;  %1992 = vrcp.f32 %v1006_v31  ;;  %v1216_v12 = vmax.f32 %v1215_v60, %v3037_v50  ;;  %v971_v10 = vadd.f32 %v970_v26, %v969_v18  ;;  %v1004_v16 = vadd.f32 %v1003_v57, %v1002_v63 }
 0x396   : > { %v1142_v4 = vadd.f32 %v3085_v49, %v1141_v54  ;;  %v1158_v39 = vmul.f32 %v3089_v58, %v1125_v43  ;;  %1994 = vrcp.f32 %v1040_v42  ;;  %v1977_v3 = vpop.eup %1976  ;;  %v1055_v6 = vadd.f32 %v1054_v59, %v1053_v62 }
 0x397   : > { %1996 = vrcp.f32 %v1074_v47  ;;  %v3101_v44 = vpop.eup %1978  ;;  %v1217_v9 = vsub.f32 %v1215_v60, %v1216_v12  ;;  %1368 = vst [vmem:[%s658_s20] sm:$0x1] %v1216_v12  ;;  %v1220_v11 = vsub.f32 %v3037_v50, %v1216_v12  ;;  %v1036_v17 = vmul.f32 %v3019_v30, %v1021_v51 }
 0x398   : > { %v1159_v48 = vadd.f32 %v1977_v3, %v1158_v39  ;;  %1998 = vrcp.f32 %v1108_v53  ;;  %v3103_v1 = vpop.eup %1980  ;;  %v1087_v7 = vmul.f32 %v3048_v61, %v1055_v6  ;;  %v1037_v23 = vmul.f32 %v3030_v40, %v1027_v55 }
 0x399   : > { %2000 = vrcp.f32 %v1142_v4  ;;  %v1070_v24 = vmul.f32 %v3046_v56, %v1055_v6  ;;  %v1218_v28 = vmul.f32 1.442695, %v1217_v9  ;;  %v1122_v31 = vmul.f32 %v3071_v29, %v1095_v27 }
 0x39a   : > { %v3109_v22 = vpop.eup %1982  ;;  %v1175_v36 = vmul.f32 %v3101_v44, %v1159_v48  ;;  %v1089_v35 = vadd.f32 %v1088_v15, %v1087_v7  ;;  %v1071_v30 = vmul.f32 %v3053_v5, %v1061_v52  ;;  %v1105_v61 = vmul.f32 %v3065_v19, %v1095_v27  ;;  %v1197_v15 = vld [vmem:[#allocation4 + $0x7] sm:$0x1] }
 0x39b   : > { %v1985_v13 = vpop.eup %1984  ;;  %v1192_v2 = vmul.f32 %v3109_v22, %v1159_v48  ;;  %v1221_v38 = vmul.f32 1.442695, %v1220_v11  ;;  %v1038_v40 = vadd.f32 %v1037_v23, %v1036_v17  ;;  %v1156_v29 = vmul.f32 %v1977_v3, %v1129_v45  ;;  %v1163_v3 = vld [vmem:[#allocation4 + $0x6] sm:$0x1] }
 0x39c   : > { %v1987_v20 = vpop.eup %1986  ;;  %v1176_v21 = vadd.f32 %v3103_v1, %v1175_v36  ;;  %v1104_v56 = vmul.f32 %v3061_v14, %v1089_v35  ;;  %v1121_v43 = vmul.f32 %v3069_v8, %v1089_v35  ;;  %v1072_v53 = vadd.f32 %v1071_v30, %v1070_v24 }
 0x39d   : > { %v1989_v33 = vpop.eup %1988  ;;  %v1193_v25 = vadd.f32 %v1985_v13, %v1192_v2  ;;  %v975_v50 = vmul.f32 %v1987_v20, %v971_v10  ;;  %v1740_v59 = vmul.f32 -1.442695, %v2961_v34  ;;  %v1139_v14 = vmul.f32 %v3085_v49, %v1129_v45 }
 0x39e   : > { %v1991_v37 = vpop.eup %1990  ;;  %2002 = vrcp.f32 %v1176_v21  ;;  %v1106_v19 = vadd.f32 %v1105_v61, %v1104_v56  ;;  %v1123_v55 = vadd.f32 %v1122_v31, %v1121_v43  ;;  %v1190_v12 = vmul.f32 %v1985_v13, %v1163_v3 }
 0x39f   : > { %v1993_v41 = vpop.eup %1992  ;;  %v1209_v42 = vmul.f32 %v1989_v33, %v1193_v25  ;;  %976 = vst [vmem:[#allocation5] sm:$0x1] %v975_v50  ;;  %2004 = vpow2.f32 %v1218_v28  ;;  %v1173_v49 = vmul.f32 %v3103_v1, %v1163_v3  ;;  %v1207_v36 = vmul.f32 %v1991_v37, %v1197_v15 }
 0x3a0   : > { %v1995_v47 = vpop.eup %1994  ;;  %v1008_v18 = vmul.f32 %v1993_v41, %v1004_v16  ;;  %2006 = vpow2.f32 %v1221_v38  ;;  %v1138_v4 = vmul.f32 %v3080_v46, %v1123_v55  ;;  %v1155_v39 = vmul.f32 %v3089_v58, %v1123_v55 }
 0x3a1   : > { %v1997_v54 = vpop.eup %1996  ;;  %v1210_v5 = vadd.f32 %v1991_v37, %v1209_v42  ;;  %v1042_v51 = vmul.f32 %v1995_v47, %v1038_v40 }
 0x3a2   : > { %v1999_v26 = vpop.eup %1998  ;;  %1010 = vst [vmem:[#allocation5 + $0x1] sm:$0x1] %v1008_v18  ;;  %v1076_v60 = vmul.f32 %v1997_v54, %v1072_v53  ;;  %v1140_v57 = vadd.f32 %v1139_v14, %v1138_v4  ;;  %v1157_v62 = vadd.f32 %v1156_v29, %v1155_v39 }
 0x3a3   : > { %1044 = vst [vmem:[#allocation5 + $0x2] sm:$0x1] %v1042_v51  ;;  %v1110_v8 = vmul.f32 %v1999_v26, %v1106_v19  ;;  %2008 = vrcp.f32 %v1210_v5  ;;  %v2001_v63 = vpop.eup %2000 }
 0x3a4   : > { %1078 = vst [vmem:[#allocation5 + $0x3] sm:$0x1] %v1076_v60  ;;  %2010 = vpow2.f32 %v1740_v59  ;;  %v1144_v34 = vmul.f32 %v2001_v63, %v1140_v57  ;;  %v1172_v48 = vmul.f32 %v3101_v44, %v1157_v62  ;;  %v1189_v52 = vmul.f32 %v3109_v22, %v1157_v62 }
 0x3a5   : > { %1112 = vst [vmem:[#allocation5 + $0x4] sm:$0x1] %v1110_v8 }
 0x3a6   : > { %1146 = vst [vmem:[#allocation5 + $0x5] sm:$0x1] %v1144_v34  ;;  %v1174_v46 = vadd.f32 %v1173_v49, %v1172_v48  ;;  %v1191_v58 = vadd.f32 %v1190_v12, %v1189_v52 }
 0x3a8   : > { %v2003_v6 = vpop.eup %2002  ;;  %v1206_v11 = vmul.f32 %v1989_v33, %v1191_v58 }
 0x3a9   : > { %v2005_v9 = vpop.eup %2004  ;;  %v1178_v10 = vmul.f32 %v2003_v6, %v1174_v46  ;;  %v1236_v24 = vld [vmem:[#allocation5 + $0x1] sm:$0x1] }
 0x3aa   : > { %v1223_v13 = vmul.f32 %v2005_v9, %v1191_v58  ;;  %v1226_v2 = vmul.f32 %v2005_v9, %v1193_v25  ;;  %v2007_v44 = vpop.eup %2006  ;;  %v1208_v1 = vadd.f32 %v1207_v36, %v1206_v11  ;;  %v1237_v27 = vld [vmem:[#allocation5 + $0x2] sm:$0x1]  ;;  %v1235_v25 = vld [vmem:[#allocation5] sm:$0x1] }
 0x3ab   : > { %1180 = vst [vmem:[#allocation5 + $0x6] sm:$0x1] %v1178_v10  ;;  %v1224_v22 = vmul.f32 %v2007_v44, %v1197_v15  ;;  %v1238_v23 = vld [vmem:[#allocation5 + $0x3] sm:$0x1]  ;;  %v1251_v35 = vcombine.low %v1235_v25, %v1236_v24 }
 0x3ac   : > { %v1227_v17 = vadd.f32 %v2007_v44, %v1226_v2  ;;  %v1252_v28 = vcombine.low %v1237_v27, %v1238_v23  ;;  %v1239_v31 = vld [vmem:[#allocation5 + $0x4] sm:$0x1] }
 0x3ad   : > { %v2009_v16 = vpop.eup %2008  ;;  %v1225_v20 = vadd.f32 %v1224_v22, %v1223_v13  ;;  %v1240_v50 = vld [vmem:[#allocation5 + $0x5] sm:$0x1]  ;;  %v1261_v42 = vrot.slane %v1251_v35, %v2959_v32 }
 0x3ae   : > { %v1212_v7 = vmul.f32 %v2009_v16, %v1208_v1  ;;  %1367 = vst [vmem:[%s652_s23] sm:$0x1] %v1227_v17  ;;  %v2011_v21 = vpop.eup %2010  ;;  %v1253_v37 = vcombine.low %v1239_v31, %v1240_v50  ;;  %v1268_v30 = vrot.slane %v1252_v28, %v2959_v32 }
 0x3af   : > { %1366 = vst [vmem:[%s646_s24] sm:$0x1] %v1225_v20  ;;  %v1232_v33 = vadd.f32 1.0, %v2011_v21 }
 0x3b0   : > { %1214 = vst [vmem:[#allocation5 + $0x7] sm:$0x1] %v1212_v7  ;;  %v1275_v40 = vrot.slane %v1253_v37, %v2959_v32  ;;  %v1283_v43 = vcombine.low %v1261_v42, %v1268_v30 }
 0x3b1   : > { %2012 = vrcp.f32 %v1232_v33 }
 0x3b2   : > { %v1241_v61 = vld [vmem:[#allocation5 + $0x6] sm:$0x1]  ;;  %v1291_v47 = vrot.slane %v1283_v43, %v2959_v32 }
 0x3b7   : > { %v1242_v38 = vld [vmem:[#allocation5 + $0x7] sm:$0x1] }
 0x3b8   : > { %v1254_v41 = vcombine.low %v1241_v61, %v1242_v38 }
 0x3ba   : > { %v1282_v56 = vrot.slane %v1254_v41, %v2959_v32 }
 0x3bb   : > { %v2013_v29 = vpop.eup %2012 }
 0x3bc   : > { %v1284_v45 = vcombine.low %v1275_v40, %v1282_v56 }
 0x3be   : > { %v1298_v18 = vrot.slane %v1284_v45, %v2959_v32 }
 0x3c0   : > { %v1299_v53 = vcombine.low %v1291_v47, %v1298_v18 }
 0x3c2   : > { %v1301_v54 = vmul.f32 %v2013_v29, %v1299_v53 }
 0x3c4   : > { %v1302_v5 = vpack.c.bf16 %v1301_v54, %v1301_v54 }
 0x3c6   : > { %1770 = vmatmul.mubr.msk.bf16.vlgmr.msra.gmra.mrb[4].mxu0 %vm663_vm0, %v1302_v5 }
 0x3c7   : > { %2315 = shalt.err (!%p2312_p2)
}
 0x3c8   : > { %s2316_s30 = scalar_lea.hbm %s3151_s1, 16  ;;  %s2320_s2 = scalar_lea.hbm %s3366_s10, 32 }
 0x3c9   : > { %p2317_p7 = scmp.ne.s32.totalorder %s3151_s1, %s2316_s30  ;;  %p2321_p6 = scmp.lt.u32.totalorder %s3151_s1, %s3366_s10 }
 0x3ca   : > { %p2322_p1 = scmp.lt.u32.totalorder %s2320_s2, %s2316_s30  ;;  %p2324_p10 = scmp.lt.u32.totalorder %s2316_s30, %s3151_s1 }
 0x3cb   : > { %p2318_p12 = pnand %p2317_p7, %p3367_p4 }
 0x3cc   : > { %p2323_p0 = por %p2322_p1, %p2321_p6 }
 0x3cd   : > { %p2319_p3 = pneg %p2318_p12 }
 0x3ce   : > { %p2325_p8 = por %p2324_p10, %p2323_p0 }
 0x3d0   : > { %p2326_p11 = pnand %p2325_p8, %p2319_p3 }
 0x3d2   : > { %2329 = shalt.err (!%p2326_p11)
}
 0x3d3   : > { %1806 = dma.vmem_to_hbm [thread:$0]  (%p3367_p4), %s1409_s22, 16, %s3151_s1, %s3157_s16  }
 0x3d4   : > { %s3368_s27 = sld [smem:[#allocation52_spill]]  ;;  %s1421_s18 = sshll.u32 %s652_s23, 4  ;;  %s1422_s18 = int_to_ptr.vmem [resolvable:$true] %s1421_s18 }
 0x3d5   : > { %s2330_s3 = scalar_lea.vmem %s1422_s18, 16  ;;  %s2501_s19 = smov [#allocation26]  }
 0x3d6   : > { %p2331_p5 = scmp.ne.s32.totalorder %s1422_s18, %s2330_s3  ;;  %s2334_s30 = sshll.u32 %s2501_s19, 4  ;;  %s2335_s30 = int_to_ptr.vmem [resolvable:$false] %s2334_s30 }
 0x3d7   : > { %s2336_s15 = scalar_lea.vmem %s2335_s30, 32  ;;  %p2337_p2 = scmp.lt.s32.totalorder %s1422_s18, %s2335_s30 }
 0x3d8   : > { %p2332_p9 = pnand %p2331_p5, %p3367_p4  ;;  %p2338_p7 = scmp.lt.s32.totalorder %s2336_s15, %s2330_s3 }
 0x3da   : > { %s3369_s29 = smov %s3368_s27  ;;  %s3181_s5 = scalar_lea.hbm %s3368_s27, %s3145_s17 }
 0x3db   : > { %p2333_p13 = pneg %p2332_p9  ;;  %p2339_p12 = por %p2338_p7, %p2337_p2 }
 0x3dd   : > { %p2340_p3 = pnand %p2339_p12, %p2333_p13 }
 0x3df   : > { %2343 = shalt.err (!%p2340_p3)
}
 0x3e0   : > { %s2344_s23 = scalar_lea.hbm %s3181_s5, 16  ;;  %s2348_s11 = scalar_lea.hbm %s3369_s29, 32 }
 0x3e1   : > { %p2345_p6 = scmp.ne.s32.totalorder %s3181_s5, %s2344_s23  ;;  %p2349_p10 = scmp.lt.u32.totalorder %s3181_s5, %s3369_s29 }
 0x3e2   : > { %p2350_p8 = scmp.lt.u32.totalorder %s2348_s11, %s2344_s23  ;;  %p2352_p5 = scmp.lt.u32.totalorder %s2344_s23, %s3181_s5 }
 0x3e3   : > { %p2346_p1 = pnand %p2345_p6, %p3367_p4 }
 0x3e4   : > { %p2351_p11 = por %p2350_p8, %p2349_p10 }
 0x3e5   : > { %p2347_p0 = pneg %p2346_p1 }
 0x3e6   : > { %p2353_p9 = por %p2352_p5, %p2351_p11 }
 0x3e8   : > { %p2354_p13 = pnand %p2353_p9, %p2347_p0 }
 0x3ea   : > { %2357 = shalt.err (!%p2354_p13)
}
 0x3eb   : > { %1807 = dma.vmem_to_hbm [thread:$0]  (%p3367_p4), %s1422_s18, 16, %s3181_s5, %s3157_s16  }
 0x3ec   : > { %s3370_s24 = sld [smem:[#allocation53_spill]]  ;;  %s1434_s3 = sshll.u32 %s658_s20, 4  ;;  %s1435_s3 = int_to_ptr.vmem [resolvable:$true] %s1434_s3 }
 0x3ed   : > { %s1383_s19 = scalar_lea.sflag [#allocation28], %s2914_s13  ;;  %s2358_s30 = scalar_lea.vmem %s1435_s3, 16 }
 0x3ee   : > { %p2359_p2 = scmp.ne.s32.totalorder %s1435_s3, %s2358_s30  ;;  %s2502_s15 = smov [#allocation27]  }
 0x3ef   : > { %s2362_s23 = sshll.u32 %s2502_s15, 4  ;;  %s2363_s23 = int_to_ptr.vmem [resolvable:$false] %s2362_s23 }
 0x3f0   : > { %p2360_p7 = pnand %p2359_p2, %p3367_p4  ;;  %s2364_s1 = scalar_lea.vmem %s2363_s23, 32 }
 0x3f1   : > { %p2365_p3 = scmp.lt.s32.totalorder %s1435_s3, %s2363_s23  ;;  %p2366_p6 = scmp.lt.s32.totalorder %s2364_s1, %s2358_s30 }
 0x3f2   : > { %s3207_s27 = scalar_lea.hbm %s3370_s24, %s3145_s17  ;;  %p2361_p12 = pneg %p2360_p7 }
 0x3f3   : > { %p2367_p1 = por %p2366_p6, %p2365_p3 }
 0x3f5   : > { %p2368_p0 = pnand %p2367_p1, %p2361_p12 }
 0x3f7   : > { %2371 = shalt.err (!%p2368_p0)
}
 0x3f8   : > { %s2372_s20 = scalar_lea.hbm %s3207_s27, 16  ;;  %s2376_s5 = scalar_lea.hbm %s3370_s24, 32 }
 0x3f9   : > { %p2373_p10 = scmp.ne.s32.totalorder %s3207_s27, %s2372_s20  ;;  %p2377_p5 = scmp.lt.u32.totalorder %s3207_s27, %s3370_s24 }
 0x3fa   : > { %p2378_p9 = scmp.lt.u32.totalorder %s2376_s5, %s2372_s20  ;;  %p2380_p2 = scmp.lt.u32.totalorder %s2372_s20, %s3207_s27 }
 0x3fb   : > { %p2374_p8 = pnand %p2373_p10, %p3367_p4 }
 0x3fc   : > { %p2379_p13 = por %p2378_p9, %p2377_p5 }
 0x3fd   : > { %p2375_p11 = pneg %p2374_p8 }
 0x3fe   : > { %p2381_p7 = por %p2380_p2, %p2379_p13 }
 0x400   : > { %p2382_p12 = pnand %p2381_p7, %p2375_p11 }
 0x402   : > { %2385 = shalt.err (!%p2382_p12)
}
 0x403   : > { %1808 = dma.vmem_to_hbm [thread:$0]  (%p3367_p4), %s1435_s3, 16, %s3207_s27, %s1383_s19   ;;  %vm1364_vm2 = vcmask 257024  }
 0x404   : > { %s1721_s11 = sshll.u32 %s2914_s13, 2  ;;  %s1745_s2 = sshll.u32 %s3358_s12, 6 }
 0x405   : > { %s640_s7 = scalar_lea.vmem [#allocation23], %s1721_s11  ;;  %s3371_s15 = sld [smem:[#allocation50_spill]] }
 0x406   : > { %s1395_s14 = sshll.u32 %s640_s7, 4  ;;  %s1370_s12 = scalar_lea.sflag [#allocation8], %s2914_s13  ;;  %s3237_s14 = int_to_ptr.vmem [resolvable:$true] %s1395_s14 }
 0x407   : > { %s2386_s27 = scalar_lea.vmem %s3237_s14, 64  ;;  %s2503_s3 = smov [#allocation23]  }
 0x408   : > { %p2387_p3 = scmp.ne.s32.totalorder %s3237_s14, %s2386_s27  ;;  %s2390_s19 = sshll.u32 %s2503_s3, 4  ;;  %s2391_s19 = int_to_ptr.vmem [resolvable:$false] %s2390_s19 }
 0x409   : > { %s2392_s1 = scalar_lea.vmem %s2391_s19, 128  ;;  %p2393_p0 = scmp.lt.s32.totalorder %s3237_s14, %s2391_s19 }
 0x40a   : > { %p2388_p6 = pnand %p2387_p3, %p3367_p4  ;;  %p2394_p10 = scmp.lt.s32.totalorder %s2392_s1, %s2386_s27 }
 0x40b   : > { %s3235_s23 = scalar_lea.hbm %s3371_s15, %s1745_s2 }
 0x40c   : > { %p2389_p1 = pneg %p2388_p6  ;;  %p2395_p8 = por %p2394_p10, %p2393_p0 }
 0x40e   : > { %p2396_p11 = pnand %p2395_p8, %p2389_p1 }
 0x499   : > { %v1356_v32 = vpop.f32.mrb[4].mxu0 }
 0x49a   : > { %v1362_v51 = vadd.f32 %v1356_v32, %v2949_v0  ;;  %v1771_v19 = vpop.f32.mrb[5].mxu0 }
 0x49b   : > { %v1359_v55 = vpop.f32.mrb[6].mxu0 }
 0x49c   : > { %v1363_v26 = vpack.c.bf16 %v1362_v51, %v1362_v51  ;;  %v1772_v59 = vpop.f32.mrb[7].mxu0 }
 0x49e   : > { %1365 = vst.msk [vmem:[%s640_s7] sm:$0xf] %vm1364_vm2, %v1363_v26 }
 0x49f   : > { %2399 = shalt.err (!%p2396_p11)
}
 0x4a0   : > { %s2400_s13 = scalar_lea.hbm %s3235_s23, 64  ;;  %s2404_s16 = scalar_lea.hbm %s3371_s15, 128 }
 0x4a1   : > { %p2401_p5 = scmp.ne.s32.totalorder %s3235_s23, %s2400_s13  ;;  %p2405_p2 = scmp.lt.u32.totalorder %s3235_s23, %s3371_s15 }
 0x4a2   : > { %p2406_p7 = scmp.lt.u32.totalorder %s2404_s16, %s2400_s13  ;;  %p2408_p3 = scmp.lt.u32.totalorder %s2400_s13, %s3235_s23 }
 0x4a3   : > { %p2402_p9 = pnand %p2401_p5, %p3367_p4 }
 0x4a4   : > { %p2407_p12 = por %p2406_p7, %p2405_p2 }
 0x4a5   : > { %p2403_p13 = pneg %p2402_p9 }
 0x4a6   : > { %p2409_p6 = por %p2408_p3, %p2407_p12 }
 0x4a8   : > { %p2410_p1 = pnand %p2409_p6, %p2403_p13 }
 0x4aa   : > { %2413 = shalt.err (!%p2410_p1)
}
 0x4ab   : > { %1805 = dma.vmem_to_hbm [thread:$0]  (%p3367_p4), %s3237_s14, 64, %s3235_s23, %s1370_s12  }
 0x4ac PF: > { %s3372_s22 = sld [smem:[#allocation38_spill]]  ;;  %s3373_s11 = sld [smem:[#allocation44_spill]] }
 0x4ad   : > { %p3375_p10 = scmp.ge.s32.totalorder %s2480_s28, 2 }
 0x4b2   : > { %s1446_s2 = sand.u32 1, %s3372_s22   ;;  %p3374_p0 = scmp.ne.s32.totalorder %s3373_s11, 0 }
 0x4b3   : > { %s1447_s7 = scalar_lea.sflag [#allocation8], %s1446_s2 }
 0x4b4   : > { %p1846_p8 = pnand %p3375_p10, %p3374_p0 }
 0x4b6   : > { %2455 = dma.done.wait (!%p1846_p8), %s1447_s7, 64  }
 0x4b7   : > { %2457 = vsyncadd (!%p1846_p8), %s1447_s7, 4294967232  ;;  %s3376_s21 = sadd.s32 4294967294, %s2480_s28  }
 0x4b8   : > { %s1455_s30 = sand.u32 1, %s3376_s21  }
 0x4b9   : > { %s1456_s27 = scalar_lea.sflag [#allocation25], %s1455_s30 }
 0x4ba   : > { %2459 = dma.done.wait (!%p1846_p8), %s1456_s27, 32  }
 0x4bb   : > { %2461 = vsyncadd (!%p1846_p8), %s1456_s27, 4294967264  ;;  %s1472_s25 = scalar_lea.sflag [#allocation28], %s1446_s2 }
 0x4bc   : > { %2463 = dma.done.wait (!%p1846_p8), %s1472_s25, 16  }
 0x4bd   : > { %2465 = vsyncadd (!%p1846_p8), %s1472_s25, 4294967280  ;;  %s3377_s28 = sld [smem:[#allocation41_spill]]  ;;  %s3378_s14 = sld [smem:[#allocation39_spill]] }
 0x4be   : > { %s3379_s27 = sld [smem:[#allocation42_spill]]  ;;  %s3380_s25 = smov %s2472_s26 }
 0x4c3   : > { %p42_p4 = scmp.ge.s32.totalorder %s3377_s28, 4   ;;  %s3381_s26 = smov %s3378_s14 }
 0x4c5   :  { %44 = sbr.rel (!%p42_p4) target bundleno = 26 (0x1a), region = 236 }
 0x4cc   :  { %1476 = vsyncpa [#allocation7], 1 }
 0x4cd   :  { %1478 = vsyncpa [#allocation7 + $0x1], 1 }
 0x4ce   :  { %1479 = vsyncpa [#allocation10], 1 }
 0x4cf   :  { %1480 = vsyncpa [#allocation13], 1 }
 0x4d0   :  { %1481 = vsyncpa [#allocation16], 1 }
 0x4d1   :  { %1482 = vsyncpa [#allocation19], 1 }
 0x4d2   :  { %1484 = vsyncpa [#allocation19 + $0x1], 1 }
 0x4d3   :  { %1485 = vsyncpa [#allocation22], 1 }
 0x4d4   :  { %1487 = vsyncpa [#allocation22 + $0x1], 1 }
 0x4d5   :  { %1488 = vsyncpa [#allocation8], 1 }
 0x4d6   :  { %1490 = vsyncpa [#allocation8 + $0x1], 1 }
 0x4d7   :  { %1491 = vsyncpa [#allocation25], 1 }
 0x4d8   :  { %1493 = vsyncpa [#allocation25 + $0x1], 1 }
 0x4d9   :  { %1494 = vsyncpa [#allocation28], 1 }
 0x4da   :  { %1496 = vsyncpa [#allocation28 + $0x1], 1 }

</bundles_post_ra>
